<compile_context>
chip_gen: v7x
topology: tpu7x:2x2x1
jax: 0.10.0
libtpu: 0.0.40
codegen_flags: <defaults>
</compile_context>

<pallas_src>
import jax
import jax.numpy as jnp
from jax.experimental import pallas as pl
from jax.experimental.pallas import tpu as pltpu

IN_DIM = 1000
HID_DIM = 1000
OUT_DIM = 1
PAD = 1024          # next multiple of 128 >= 1000 (lane-dense tiles)
TK = 512            # K-block of the fused weight streamed per grid step
K_STEPS = (2 * PAD) // TK   # = 4

assert 2 * PAD == K_STEPS * TK
assert TK < IN_DIM <= 2 * TK          # each input occupies exactly two K slabs


def _net_kernel(x_ref, y_ref, w12_ref, b12_ref, w3_ref, b3_ref, out_ref,
                xy_ref, acc_ref):
    k = pl.program_id(0)

    @pl.when(k == 0)
    def _():
        # Pack [x || y], zero-padded 1000->1024 per input, into K_STEPS slabs of
        # width TK.  Padded lanes stay 0 (they hit zero weight rows anyway, but
        # zeros keep any stale VMEM garbage out of the MXU).
        xy_ref[...] = jnp.zeros_like(xy_ref)
        xy_ref[0] = x_ref[:, :TK].astype(xy_ref.dtype)
        xy_ref[1, :, :IN_DIM - TK] = x_ref[:, TK:].astype(xy_ref.dtype)
        xy_ref[2] = y_ref[:, :TK].astype(xy_ref.dtype)
        xy_ref[3, :, :IN_DIM - TK] = y_ref[:, TK:].astype(xy_ref.dtype)
        acc_ref[...] = jnp.zeros_like(acc_ref)

    # One K-block of the fused fc1/fc2 matmul: (B, TK) @ (TK, PAD), f32 accumulate.
    acc_ref[...] += jnp.dot(xy_ref[k].astype(w12_ref.dtype), w12_ref[...],
                            preferred_element_type=jnp.float32)

    @pl.when(k == pl.num_programs(0) - 1)
    def _():
        # Epilogue: h = relu(acc + (b1+b2)); out = h @ W3^T + b3 as a VPU mul +
        # row reduction (fc3 has a single output unit).
        h = jnp.maximum(acc_ref[...] + b12_ref[...], 0.0)
        out = jnp.sum(h * w3_ref[...], axis=-1, keepdims=True) + b3_ref[...]
        out_ref[...] = out.astype(out_ref.dtype)


def prepare_params(params, weight_dtype=jnp.bfloat16):
    """One-time param prep (NOT per forward call): transpose to [in,out],
    zero-pad 1000->1024, stack W1^T;W2^T, fold b1+b2.  The big weight stream is
    cast to `weight_dtype` (bf16 default = half the HBM traffic; f32 keeps the
    exact PyTorch-module semantics).  Small params stay f32."""
    w1p = jnp.zeros((PAD, PAD), jnp.float32).at[:IN_DIM, :HID_DIM].set(
        params["w1"].T.astype(jnp.float32))
    w2p = jnp.zeros((PAD, PAD), jnp.float32).at[:IN_DIM, :HID_DIM].set(
        params["w2"].T.astype(jnp.float32))
    w12 = jnp.concatenate([w1p, w2p], axis=0).astype(weight_dtype)  # (2048, 1024)
    b12 = jnp.zeros((1, PAD), jnp.float32).at[:, :HID_DIM].set(
        (params["b1"] + params["b2"]).reshape(1, HID_DIM).astype(jnp.float32))
    w3 = jnp.zeros((1, PAD), jnp.float32).at[:, :HID_DIM].set(
        params["w3"].reshape(1, HID_DIM).astype(jnp.float32))
    b3 = params["b3"].reshape(1, OUT_DIM).astype(jnp.float32)
    return {"w12": w12, "b12": b12, "w3": w3, "b3": b3}


def net_forward(x, y, prep):
    """x, y: [B, 1000] float32. prep: output of prepare_params()."""
    B = x.shape[0]
    wdt = prep["w12"].dtype

    grid_spec = pltpu.PrefetchScalarGridSpec(
        num_scalar_prefetch=0,
        grid=(K_STEPS,),
        in_specs=[
            pl.BlockSpec((B, IN_DIM), lambda k: (0, 0)),      # x (full array)
            pl.BlockSpec((B, IN_DIM), lambda k: (0, 0)),      # y (full array)
            pl.BlockSpec((TK, PAD), lambda k: (k, 0)),        # w12 K row-block
            pl.BlockSpec((1, PAD), lambda k: (0, 0)),         # b1 + b2
            pl.BlockSpec((1, PAD), lambda k: (0, 0)),         # W3 row
            pl.BlockSpec((1, OUT_DIM), lambda k: (0, 0)),     # b3
        ],
        out_specs=pl.BlockSpec((B, OUT_DIM), lambda k: (0, 0)),
        scratch_shapes=[
            pltpu.VMEM((K_STEPS, B, TK), jnp.float32),        # packed [x||y] slabs
            pltpu.VMEM((B, PAD), jnp.float32),                # fc1+fc2 accumulator
        ],
    )

    return pl.pallas_call(
        _net_kernel,
        out_shape=jax.ShapeDtypeStruct((B, OUT_DIM), jnp.float32),
        grid_spec=grid_spec,
        compiler_params=pltpu.CompilerParams(
            dimension_semantics=("arbitrary",)),
    )(x, y, prep["w12"], prep["b12"], prep["w3"], prep["b3"])


def init_params(key):
    """Deterministic init, PyTorch nn.Linear-style uniform(-1/sqrt(fan_in), ...)."""
    ks = jax.random.split(key, 6)
    s1 = 1.0 / jnp.sqrt(IN_DIM)
    s3 = 1.0 / jnp.sqrt(HID_DIM)
    return {
        "w1": jax.random.uniform(ks[0], (HID_DIM, IN_DIM), jnp.float32, -s1, s1),
        "b1": jax.random.uniform(ks[1], (HID_DIM,), jnp.float32, -s1, s1),
        "w2": jax.random.uniform(ks[2], (HID_DIM, IN_DIM), jnp.float32, -s1, s1),
        "b2": jax.random.uniform(ks[3], (HID_DIM,), jnp.float32, -s1, s1),
        "w3": jax.random.uniform(ks[4], (OUT_DIM, HID_DIM), jnp.float32, -s3, s3),
        "b3": jax.random.uniform(ks[5], (OUT_DIM,), jnp.float32, -s3, s3),
    }


def net_ref(x, y, p):
    h1 = jax.nn.relu(x @ p["w1"].T + p["b1"] + y @ p["w2"].T + p["b2"])
    return h1 @ p["w3"].T + p["b3"]


if __name__ == "__main__":
    key = jax.random.PRNGKey(0)
    kp, kx, ky = jax.random.split(key, 3)
    params = init_params(kp)

    B = 8
    x = jax.random.normal(kx, (B, IN_DIM), jnp.float32)
    y = jax.random.normal(ky, (B, IN_DIM), jnp.float32)

    # ---- f32 weights: exact semantics of the PyTorch module ----
    prep_f32 = jax.block_until_ready(prepare_params(params, jnp.float32))
    out = jax.block_until_ready(net_forward(x, y, prep_f32))
    ref = net_ref(x, y, params)
    assert out.shape == (B, OUT_DIM), out.shape
    assert jnp.allclose(out, ref, atol=1e-4, rtol=1e-4), (out, ref)

    # ---- default bf16 weight stream (bandwidth lever); checked against a
    #      reference using the same bf16-rounded weights/activations ----
    prep_bf16 = jax.block_until_ready(prepare_params(params))
    out_bf = jax.block_until_ready(net_forward(x, y, prep_bf16))
    rp = {k: (v.astype(jnp.bfloat16).astype(jnp.float32)
              if k in ("w1", "w2") else v) for k, v in params.items()}
    ref_bf = net_ref(x.astype(jnp.bfloat16).astype(jnp.float32),
                     y.astype(jnp.bfloat16).astype(jnp.float32), rp)
    assert jnp.allclose(out_bf, ref_bf, atol=2e-3, rtol=2e-3), (out_bf, ref_bf)

    print("KERNEL_OK")
</pallas_src>

<mosaic_0001>
module attributes {stable_mosaic.version = 11 : i64} {
  func.func @_net_kernel(%arg0: i32, %arg1: memref<8x1000xf32, #tpu.memory_space<vmem>>, %arg2: memref<8x1000xf32, #tpu.memory_space<vmem>>, %arg3: memref<512x1024xf32, #tpu.memory_space<vmem>>, %arg4: memref<1x1024xf32, #tpu.memory_space<vmem>>, %arg5: memref<1x1024xf32, #tpu.memory_space<vmem>>, %arg6: memref<1x1xf32, #tpu.memory_space<vmem>>, %arg7: memref<8x1xf32, #tpu.memory_space<vmem>>, %arg8: memref<4x8x512xf32, #tpu.memory_space<vmem>>, %arg9: memref<8x1024xf32, #tpu.memory_space<vmem>>) attributes {dimension_semantics = [#tpu.dimension_semantics<arbitrary>], iteration_bounds = array<i64: 4>, scalar_prefetch = 0 : i64, scratch_operands = 2 : i64, tpu.core_type = #tpu.core_type<tc>, window_params = [{pipeline_mode = #tpu.pipeline_mode<synchronous>, transform_indices = @transform_0, window_bounds = array<i64: 8, 1000>}, {pipeline_mode = #tpu.pipeline_mode<synchronous>, transform_indices = @transform_1, window_bounds = array<i64: 8, 1000>}, {transform_indices = @transform_2, window_bounds = array<i64: 512, 1024>}, {pipeline_mode = #tpu.pipeline_mode<synchronous>, transform_indices = @transform_3, window_bounds = array<i64: 1, 1024>}, {pipeline_mode = #tpu.pipeline_mode<synchronous>, transform_indices = @transform_4, window_bounds = array<i64: 1, 1024>}, {pipeline_mode = #tpu.pipeline_mode<synchronous>, transform_indices = @transform_5, window_bounds = array<i64: 1, 1>}, {pipeline_mode = #tpu.pipeline_mode<synchronous>, transform_indices = @transform_6, window_bounds = array<i64: 8, 1>}]} {
    %c0_i32 = arith.constant 0 : i32
    %0 = arith.cmpi eq, %arg0, %c0_i32 : i32
    %1 = arith.extui %0 : i1 to i32
    %c0_i32_0 = arith.constant 0 : i32
    %2 = arith.cmpi ne, %1, %c0_i32_0 : i32
    scf.if %2 {
      %cst_9 = arith.constant 0.000000e+00 : f32
      %14 = vector.broadcast %cst_9 : f32 to vector<4x8x512xf32>
      %c0_10 = arith.constant 0 : index
      %c0_11 = arith.constant 0 : index
      %c0_12 = arith.constant 0 : index
      %15 = vector.load %arg8[%c0_10, %c0_11, %c0_12] : memref<4x8x512xf32, #tpu.memory_space<vmem>>, vector<4x8x512xf32>
      tpu.vector_store %arg8[%c0_10, %c0_11, %c0_12], %14 {strides = array<i32>} : memref<4x8x512xf32, #tpu.memory_space<vmem>>, vector<4x8x512xf32>,
      %c0_13 = arith.constant 0 : index
      %c0_14 = arith.constant 0 : index
      %16 = vector.load %arg1[%c0_13, %c0_14] : memref<8x1000xf32, #tpu.memory_space<vmem>>, vector<8x512xf32>
      %c0_15 = arith.constant 0 : index
      %c0_16 = arith.constant 0 : index
      %c0_17 = arith.constant 0 : index
      %17 = vector.load %arg8[%c0_15, %c0_16, %c0_17] : memref<4x8x512xf32, #tpu.memory_space<vmem>>, vector<1x8x512xf32>
      %18 = vector.shape_cast %17 : vector<1x8x512xf32> to vector<8x512xf32>
      %19 = vector.shape_cast %16 : vector<8x512xf32> to vector<1x8x512xf32>
      tpu.vector_store %arg8[%c0_15, %c0_16, %c0_17], %19 {strides = array<i32>} : memref<4x8x512xf32, #tpu.memory_space<vmem>>, vector<1x8x512xf32>,
      %c0_18 = arith.constant 0 : index
      %c512 = arith.constant 512 : index
      %20 = vector.load %arg1[%c0_18, %c512] : memref<8x1000xf32, #tpu.memory_space<vmem>>, vector<8x488xf32>
      %c1 = arith.constant 1 : index
      %c0_19 = arith.constant 0 : index
      %c0_20 = arith.constant 0 : index
      %21 = vector.load %arg8[%c1, %c0_19, %c0_20] : memref<4x8x512xf32, #tpu.memory_space<vmem>>, vector<1x8x488xf32>
      %22 = vector.shape_cast %21 : vector<1x8x488xf32> to vector<8x488xf32>
      %23 = vector.shape_cast %20 : vector<8x488xf32> to vector<1x8x488xf32>
      tpu.vector_store %arg8[%c1, %c0_19, %c0_20], %23 {strides = array<i32>} : memref<4x8x512xf32, #tpu.memory_space<vmem>>, vector<1x8x488xf32>,
      %c0_21 = arith.constant 0 : index
      %c0_22 = arith.constant 0 : index
      %24 = vector.load %arg2[%c0_21, %c0_22] : memref<8x1000xf32, #tpu.memory_space<vmem>>, vector<8x512xf32>
      %c2 = arith.constant 2 : index
      %c0_23 = arith.constant 0 : index
      %c0_24 = arith.constant 0 : index
      %25 = vector.load %arg8[%c2, %c0_23, %c0_24] : memref<4x8x512xf32, #tpu.memory_space<vmem>>, vector<1x8x512xf32>
      %26 = vector.shape_cast %25 : vector<1x8x512xf32> to vector<8x512xf32>
      %27 = vector.shape_cast %24 : vector<8x512xf32> to vector<1x8x512xf32>
      tpu.vector_store %arg8[%c2, %c0_23, %c0_24], %27 {strides = array<i32>} : memref<4x8x512xf32, #tpu.memory_space<vmem>>, vector<1x8x512xf32>,
      %c0_25 = arith.constant 0 : index
      %c512_26 = arith.constant 512 : index
      %28 = vector.load %arg2[%c0_25, %c512_26] : memref<8x1000xf32, #tpu.memory_space<vmem>>, vector<8x488xf32>
      %c3 = arith.constant 3 : index
      %c0_27 = arith.constant 0 : index
      %c0_28 = arith.constant 0 : index
      %29 = vector.load %arg8[%c3, %c0_27, %c0_28] : memref<4x8x512xf32, #tpu.memory_space<vmem>>, vector<1x8x488xf32>
      %30 = vector.shape_cast %29 : vector<1x8x488xf32> to vector<8x488xf32>
      %31 = vector.shape_cast %28 : vector<8x488xf32> to vector<1x8x488xf32>
      tpu.vector_store %arg8[%c3, %c0_27, %c0_28], %31 {strides = array<i32>} : memref<4x8x512xf32, #tpu.memory_space<vmem>>, vector<1x8x488xf32>,
      %cst_29 = arith.constant 0.000000e+00 : f32
      %32 = vector.broadcast %cst_29 : f32 to vector<8x1024xf32>
      %c0_30 = arith.constant 0 : index
      %c0_31 = arith.constant 0 : index
      %33 = vector.load %arg9[%c0_30, %c0_31] : memref<8x1024xf32, #tpu.memory_space<vmem>>, vector<8x1024xf32>
      tpu.vector_store %arg9[%c0_30, %c0_31], %32 {strides = array<i32>} : memref<8x1024xf32, #tpu.memory_space<vmem>>, vector<8x1024xf32>,
    } else {
    }
    %c0 = arith.constant 0 : index
    %c0_1 = arith.constant 0 : index
    %3 = vector.load %arg9[%c0, %c0_1] : memref<8x1024xf32, #tpu.memory_space<vmem>>, vector<8x1024xf32>
    %4 = arith.index_cast %arg0 : i32 to index
    %c0_2 = arith.constant 0 : index
    %c0_3 = arith.constant 0 : index
    %5 = vector.load %arg8[%4, %c0_2, %c0_3] : memref<4x8x512xf32, #tpu.memory_space<vmem>>, vector<1x8x512xf32>
    %6 = vector.shape_cast %5 : vector<1x8x512xf32> to vector<8x512xf32>
    %c0_4 = arith.constant 0 : index
    %c0_5 = arith.constant 0 : index
    %7 = vector.load %arg3[%c0_4, %c0_5] : memref<512x1024xf32, #tpu.memory_space<vmem>>, vector<512x1024xf32>
    %cst = arith.constant dense<0.000000e+00> : vector<8x1024xf32>
    %8 = tpu.matmul %6, %7, %cst {dimension_numbers = #tpu.dot_dimension_numbers<[1], [0], [0], [1], [0, 0, 1, 1], [], []>} : vector<8x512xf32>, vector<512x1024xf32>, vector<8x1024xf32> -> vector<8x1024xf32>
    %9 = arith.addf %3, %8 : vector<8x1024xf32>
    %c0_6 = arith.constant 0 : index
    %c0_7 = arith.constant 0 : index
    %10 = vector.load %arg9[%c0_6, %c0_7] : memref<8x1024xf32, #tpu.memory_space<vmem>>, vector<8x1024xf32>
    tpu.vector_store %arg9[%c0_6, %c0_7], %9 {strides = array<i32>} : memref<8x1024xf32, #tpu.memory_space<vmem>>, vector<8x1024xf32>,
    %c3_i32 = arith.constant 3 : i32
    %11 = arith.cmpi eq, %arg0, %c3_i32 : i32
    %12 = arith.extui %11 : i1 to i32
    %c0_i32_8 = arith.constant 0 : i32
    %13 = arith.cmpi ne, %12, %c0_i32_8 : i32
    scf.if %13 {
      %c0_9 = arith.constant 0 : index
      %c0_10 = arith.constant 0 : index
      %14 = vector.load %arg9[%c0_9, %c0_10] : memref<8x1024xf32, #tpu.memory_space<vmem>>, vector<8x1024xf32>
      %c0_11 = arith.constant 0 : index
      %c0_12 = arith.constant 0 : index
      %15 = vector.load %arg4[%c0_11, %c0_12] : memref<1x1024xf32, #tpu.memory_space<vmem>>, vector<1x1024xf32>
      %16 = vector.broadcast %15 : vector<1x1024xf32> to vector<8x1024xf32>
      %17 = arith.addf %14, %16 : vector<8x1024xf32>
      %cst_13 = arith.constant 0.000000e+00 : f32
      %18 = vector.broadcast %cst_13 : f32 to vector<8x1024xf32>
      %19 = arith.maximumf %17, %18 : vector<8x1024xf32>
      %c0_14 = arith.constant 0 : index
      %c0_15 = arith.constant 0 : index
      %20 = vector.load %arg5[%c0_14, %c0_15] : memref<1x1024xf32, #tpu.memory_space<vmem>>, vector<1x1024xf32>
      %21 = vector.broadcast %20 : vector<1x1024xf32> to vector<8x1024xf32>
      %22 = arith.mulf %19, %21 : vector<8x1024xf32>
      %cst_16 = arith.constant dense<0.000000e+00> : vector<8xf32>
      %23 = vector.multi_reduction <add>, %22, %cst_16 [1] : vector<8x1024xf32> to vector<8xf32>
      %24 = vector.shape_cast %23 : vector<8xf32> to vector<8x1xf32>
      %c0_17 = arith.constant 0 : index
      %c0_18 = arith.constant 0 : index
      %25 = vector.load %arg6[%c0_17, %c0_18] : memref<1x1xf32, #tpu.memory_space<vmem>>, vector<1x1xf32>
      %26 = vector.broadcast %25 : vector<1x1xf32> to vector<8x1xf32>
      %27 = arith.addf %24, %26 : vector<8x1xf32>
      %c0_19 = arith.constant 0 : index
      %c0_20 = arith.constant 0 : index
      %28 = vector.load %arg7[%c0_19, %c0_20] : memref<8x1xf32, #tpu.memory_space<vmem>>, vector<8x1xf32>
      tpu.vector_store %arg7[%c0_19, %c0_20], %27 {strides = array<i32>} : memref<8x1xf32, #tpu.memory_space<vmem>>, vector<8x1xf32>,
    } else {
    }
    return
  }
  func.func @transform_0(%arg0: i32) -> (i32, i32) {
    %c0_i32 = arith.constant 0 : i32
    %c0_i32_0 = arith.constant 0 : i32
    %c0_i32_1 = arith.constant 0 : i32
    return %c0_i32, %c0_i32_0 : i32, i32
  }
  func.func @transform_1(%arg0: i32) -> (i32, i32) {
    %c0_i32 = arith.constant 0 : i32
    %c0_i32_0 = arith.constant 0 : i32
    %c0_i32_1 = arith.constant 0 : i32
    return %c0_i32, %c0_i32_0 : i32, i32
  }
  func.func @transform_2(%arg0: i32) -> (i32, i32) {
    %c0_i32 = arith.constant 0 : i32
    %c0_i32_0 = arith.constant 0 : i32
    return %arg0, %c0_i32 : i32, i32
  }
  func.func @transform_3(%arg0: i32) -> (i32, i32) {
    %c0_i32 = arith.constant 0 : i32
    %c0_i32_0 = arith.constant 0 : i32
    %c0_i32_1 = arith.constant 0 : i32
    return %c0_i32, %c0_i32_0 : i32, i32
  }
  func.func @transform_4(%arg0: i32) -> (i32, i32) {
    %c0_i32 = arith.constant 0 : i32
    %c0_i32_0 = arith.constant 0 : i32
    %c0_i32_1 = arith.constant 0 : i32
    return %c0_i32, %c0_i32_0 : i32, i32
  }
  func.func @transform_5(%arg0: i32) -> (i32, i32) {
    %c0_i32 = arith.constant 0 : i32
    %c0_i32_0 = arith.constant 0 : i32
    %c0_i32_1 = arith.constant 0 : i32
    return %c0_i32, %c0_i32_0 : i32, i32
  }
  func.func @transform_6(%arg0: i32) -> (i32, i32) {
    %c0_i32 = arith.constant 0 : i32
    %c0_i32_0 = arith.constant 0 : i32
    %c0_i32_1 = arith.constant 0 : i32
    return %c0_i32, %c0_i32_0 : i32, i32
  }
}

</mosaic_0001>

<bundles_post_ra>
// kernel: tpu_custom_call.1
= control target key start
LH: loop header
LB: loop body
LE: loop exit
PB: predicated region body
PF: predicated region fallthrough
CT: control target
= control target key end

     0   :  { %s3349_s0 = inlined_call_operand.hbm [shape: f32[8,1000], index: 0, kind: input, shape index: {}]   ;;  %s3350_s1 = inlined_call_operand.hbm [shape: f32[8,1000], index: 1, kind: input, shape index: {}]   ;;  %s3351_s2 = inlined_call_operand.hbm [shape: f32[2048,1024], index: 2, kind: input, shape index: {}]   ;;  %s3352_s3 = inlined_call_operand.hbm [shape: f32[1,1024], index: 3, kind: input, shape index: {}]   ;;  %s3353_s4 = inlined_call_operand.hbm [shape: f32[1,1024], index: 4, kind: input, shape index: {}]   ;;  %s3354_s5 = inlined_call_operand.<no memory space> [shape: f32[1,1], index: 5, kind: input, shape index: {}]   ;;  %s3355_s6 = inlined_call_operand.vmem [shape: f32[8,1], index: 6, kind: output, shape index: {}]  }
   0x1   :  { %v11_v0 = vstv %s3354_s5 }
   0x2   :  { %12 = vst [vmem:[#allocation4] sm:$0x1] %v11_v0 }
   0x3   :  { %13 = vsyncpa [#allocation6], 0 }
   0x4   :  { %14 = vsyncpa [#allocation8], 0 }
   0x5   :  { %15 = vsyncpa [#allocation12], 0  ;;  %s2573_s23 = smov 0   ;;  %s2575_s24 = smov 0  }
   0x6   :  { %s2577_s25 = smov 0   ;;  %s2579_s26 = smov 0  }
   0x7 LB: > { %s2592_s5 = sadd.s32 4294967295, %s2525_s26   ;;  %p83_p0 = scmp.ne.s32.totalorder %s2517_s24, %s2513_s23  ;;  %s2525_s26 = sphi %s2579_s26, %s3378_s26   ;;  %s2521_s25 = sphi %s2577_s25, %s3377_s25   ;;  %s2517_s24 = sphi %s2575_s24, %s3376_s24   ;;  %s2513_s23 = sphi %s2573_s23, %s3375_s23  }
   0x8   : > { %p3356_p1 = scmp.eq.s32.totalorder %s2592_s5, 0  ;;  %p1703_p2 = scmp.ge.s32.totalorder %s2525_s26, 1 }
   0x9   : > { %p178_p3 = scmp.lt.s32.totalorder %s2525_s26, 5  ;;  %s2527_s29 = smov [#allocation5]  }
   0xa   : > { %p2601_p5 = por %p3356_p1, %p83_p0  ;;  %s191_s30 = sshll.u32 %s2527_s29, 4  ;;  %s192_s30 = int_to_ptr.vmem [resolvable:$true] %s191_s30 }
   0xb   : > { %p2605_p6 = pnand %p1703_p2, %p178_p3  ;;  %s2528_s7 = smov [#allocation7]  }
   0xc   : > { %s3359_s27 = scalar_select %p2601_p5, 1, 0 }
   0xd   : > { %s3360_s28 = scalar_select %p2605_p6, 1, 0 }
   0xe   : > { %p2267_p7 = pneg %p2605_p6  ;;  %s202_s8 = sshll.u32 %s2528_s7, 4  ;;  %s2617_s8 = int_to_ptr.vmem [resolvable:$true] %s202_s8 }
   0xf   : > { %s2529_s10 = smov [#allocation10]   ;;  %s2333_s14 = scalar_lea.hbm %s3349_s0, 1024 }
  0x10   : > { %p2613_p8 = pnand %p2267_p7, %p3356_p1  ;;  %s213_s11 = sshll.u32 %s2529_s10, 4  ;;  %s2619_s11 = int_to_ptr.vmem [resolvable:$true] %s213_s11 }
  0x11   : > { %p2334_p9 = scmp.ne.s32.totalorder %s3349_s0, %s2333_s14  ;;  %p2340_p13 = scmp.lt.u32.totalorder %s2333_s14, %s3349_s0 }
  0x12   : > { %p2629_p10 = pneg %p2613_p8 }
  0x14   : > { %p2336_p11 = pnand %p2629_p10, %p2334_p9 }
  0x16   : > { %p2337_p12 = pneg %p2336_p11 }
  0x18   : > { %p2342_p0 = pnand %p2340_p13, %p2337_p12 }
  0x1a   : > { %2345 = shalt.err (!%p2342_p0)
}
  0x1b   : > { %s2346_s20 = scalar_lea.vmem %s192_s30, 1024  ;;  %p2354_p4 = scmp.lt.s32.totalorder %s192_s30, %s192_s30 }
  0x1c   : > { %p2347_p2 = scmp.ne.s32.totalorder %s192_s30, %s2346_s20  ;;  %p2355_p1 = scmp.lt.s32.totalorder %s2346_s20, %s2346_s20 }
  0x1e   : > { %p2349_p3 = pnand %p2347_p2, %p2629_p10  ;;  %p2356_p5 = por %p2355_p1, %p2354_p4 }
  0x20   : > { %p2350_p7 = pneg %p2349_p3 }
  0x22   : > { %p2357_p6 = pnand %p2356_p5, %p2350_p7 }
  0x24   : > { %2360 = shalt.err (!%p2357_p6)
}
  0x25   : > { %2270 = dma.hbm_to_vmem [thread:$0]  (!%p2613_p8), %s3349_s0, 1024, %s192_s30, [#allocation6]  }
  0x26   : > { %s2361_s7 = scalar_lea.hbm %s3350_s1, 1024 }
  0x27   : > { %p2362_p9 = scmp.ne.s32.totalorder %s3350_s1, %s2361_s7  ;;  %p2368_p4 = scmp.lt.u32.totalorder %s2361_s7, %s3350_s1 }
  0x29   : > { %p2364_p11 = pnand %p2362_p9, %p2629_p10 }
  0x2b   : > { %p2365_p1 = pneg %p2364_p11 }
  0x2d   : > { %p2370_p5 = pnand %p2368_p4, %p2365_p1 }
  0x2f   : > { %2373 = shalt.err (!%p2370_p5)
}
  0x30   : > { %s2374_s30 = scalar_lea.vmem %s2617_s8, 1024  ;;  %p2382_p0 = scmp.lt.s32.totalorder %s2617_s8, %s2617_s8 }
  0x31   : > { %p2375_p6 = scmp.ne.s32.totalorder %s2617_s8, %s2374_s30  ;;  %p2383_p2 = scmp.lt.s32.totalorder %s2374_s30, %s2374_s30 }
  0x33   : > { %p2377_p12 = pnand %p2375_p6, %p2629_p10  ;;  %p2384_p3 = por %p2383_p2, %p2382_p0 }
  0x35   : > { %p2378_p13 = pneg %p2377_p12 }
  0x37   : > { %p2385_p7 = pnand %p2384_p3, %p2378_p13 }
  0x39   : > { %2388 = shalt.err (!%p2385_p7)
}
  0x3a   : > { %2273 = dma.hbm_to_vmem [thread:$0]  (!%p2613_p8), %s3350_s1, 1024, %s2617_s8, [#allocation8]  }
  0x3b   : > { %s2389_s20 = scalar_lea.hbm %s3352_s3, 128 }
  0x3c   : > { %p2390_p9 = scmp.ne.s32.totalorder %s3352_s3, %s2389_s20  ;;  %p2396_p4 = scmp.lt.u32.totalorder %s2389_s20, %s3352_s3 }
  0x3e   : > { %p2392_p11 = pnand %p2390_p9, %p2629_p10 }
  0x40   : > { %p2393_p1 = pneg %p2392_p11 }
  0x42   : > { %p2398_p5 = pnand %p2396_p4, %p2393_p1 }
  0x44   : > { %2401 = shalt.err (!%p2398_p5)
}
  0x45   : > { %s2402_s8 = scalar_lea.vmem %s2619_s11, 128  ;;  %p2410_p0 = scmp.lt.s32.totalorder %s2619_s11, %s2619_s11 }
  0x46   : > { %p2403_p6 = scmp.ne.s32.totalorder %s2619_s11, %s2402_s8  ;;  %p2411_p2 = scmp.lt.s32.totalorder %s2402_s8, %s2402_s8 }
  0x48   : > { %p2405_p12 = pnand %p2403_p6, %p2629_p10  ;;  %p2412_p3 = por %p2411_p2, %p2410_p0 }
  0x4a   : > { %p2406_p13 = pneg %p2405_p12 }
  0x4c   : > { %p2413_p7 = pnand %p2412_p3, %p2406_p13 }
  0x4e   : > { %2416 = shalt.err (!%p2413_p7)
}
  0x4f   : > { %2276 = dma.hbm_to_vmem [thread:$0]  (!%p2613_p8), %s3352_s3, 128, %s2619_s11, [#allocation8]  }
  0x50   : > { %s2530_s12 = smov [#allocation11]   ;;  %s2417_s15 = scalar_lea.hbm %s3353_s4, 128 }
  0x51   : > { %s224_s13 = sshll.u32 %s2530_s12, 4  ;;  %p2418_p9 = scmp.ne.s32.totalorder %s3353_s4, %s2417_s15  ;;  %s225_s13 = int_to_ptr.vmem [resolvable:$true] %s224_s13 }
  0x52   : > { %p2424_p4 = scmp.lt.u32.totalorder %s2417_s15, %s3353_s4 }
  0x53   : > { %p2420_p11 = pnand %p2418_p9, %p2629_p10 }
  0x55   : > { %p2421_p1 = pneg %p2420_p11 }
  0x57   : > { %p2426_p5 = pnand %p2424_p4, %p2421_p1 }
  0x59   : > { %2429 = shalt.err (!%p2426_p5)
}
  0x5a   : > { %s2430_s11 = scalar_lea.vmem %s225_s13, 128  ;;  %p2438_p0 = scmp.lt.s32.totalorder %s225_s13, %s225_s13 }
  0x5b   : > { %p2431_p6 = scmp.ne.s32.totalorder %s225_s13, %s2430_s11  ;;  %p2439_p2 = scmp.lt.s32.totalorder %s2430_s11, %s2430_s11 }
  0x5d   : > { %p2433_p12 = pnand %p2431_p6, %p2629_p10  ;;  %p2440_p3 = por %p2439_p2, %p2438_p0 }
  0x5f   : > { %p2434_p13 = pneg %p2433_p12 }
  0x61   : > { %p2441_p7 = pnand %p2440_p3, %p2434_p13 }
  0x63   : > { %2444 = shalt.err (!%p2441_p7)
}
  0x64   : > { %2279 = dma.hbm_to_vmem [thread:$0]  (!%p2613_p8), %s3353_s4, 128, %s225_s13, [#allocation12]  }
  0x65   : > { %s2710_s17 = sadd.s32 1, %s2525_s26   ;;  %s70_s23 = sadd.s32 1, %s2521_s25 }
  0x66   : > { %s67_s9 = ssub.s32 %s2525_s26, %s2710_s17  ;;  %p77_p10 = scmp.ne.s32.totalorder %s2521_s25, %s2517_s24 }
  0x67   : > { %p68_p9 = scmp.eq.s32.totalorder %s67_s9, 0  ;;  %p78_p11 = scmp.eq.s32.totalorder %s2525_s26, 0 }
  0x68   : > { %p2288_p1 = scmp.lt.s32.totalorder %s2525_s26, 4  ;;  %s238_s29 = sand.u32 1, %s2525_s26  }
  0x69   : > { %s2721_s8 = scalar_select %p68_p9, %s2521_s25, %s70_s23  }
  0x6a   : > { %p79_p4 = por %p78_p11, %p77_p10  ;;  %s240_s7 = sand.u32 1, %s2521_s25  }
  0x6b   : > { %s1727_s10 = sshll.u32 %s2525_s26, 16  ;;  %s1709_s12 = sshll.u32 %s240_s7, 12 }
  0x6c   : > { %s2728_s13 = scalar_lea.hbm %s3351_s2, %s1727_s10  ;;  %p2730_p8 = pnand %p2288_p1, %p79_p4 }
  0x6d   : > { %s242_s16 = scalar_lea.vmem [#allocation9], %s1709_s12  ;;  %s2736_s26 = scalar_lea.sflag [#allocation6], %s238_s29 }
  0x6e   : > { %s250_s18 = sshll.u32 %s242_s16, 4  ;;  %s2445_s19 = scalar_lea.hbm %s2728_s13, 65536  ;;  %s2734_s18 = int_to_ptr.vmem [resolvable:$true] %s250_s18 }
  0x6f   : > { %p2446_p5 = scmp.ne.s32.totalorder %s2728_s13, %s2445_s19  ;;  %p2447_p6 = pneg %p2730_p8 }
  0x70   : > { %s2450_s21 = scalar_lea.hbm %s3351_s2, 262144  ;;  %p2451_p0 = scmp.lt.u32.totalorder %s2728_s13, %s3351_s2 }
  0x71   : > { %p2448_p12 = pnand %p2447_p6, %p2446_p5  ;;  %p2452_p2 = scmp.lt.u32.totalorder %s2450_s21, %s2445_s19 }
  0x72   : > { %p2454_p7 = scmp.lt.u32.totalorder %s2445_s19, %s2728_s13 }
  0x73   : > { %p2449_p13 = pneg %p2448_p12  ;;  %p2453_p3 = por %p2452_p2, %p2451_p0 }
  0x75   : > { %p2455_p10 = por %p2454_p7, %p2453_p3 }
  0x77   : > { %p2456_p9 = pnand %p2455_p10, %p2449_p13 }
  0x79   : > { %2459 = shalt.err (!%p2456_p9)
}
  0x7a   : > { %s2460_s9 = scalar_lea.vmem %s2734_s18, 65536  ;;  %s2531_s29 = smov [#allocation9]  }
  0x7b   : > { %p2461_p11 = scmp.ne.s32.totalorder %s2734_s18, %s2460_s9  ;;  %s2465_s7 = sshll.u32 %s2531_s29, 4  ;;  %s2466_s7 = int_to_ptr.vmem [resolvable:$false] %s2465_s7 }
  0x7c   : > { %s2467_s10 = scalar_lea.vmem %s2466_s7, 131072  ;;  %p2468_p5 = scmp.lt.s32.totalorder %s2734_s18, %s2466_s7 }
  0x7d   : > { %p2463_p1 = pnand %p2461_p11, %p2447_p6  ;;  %p2469_p12 = scmp.lt.s32.totalorder %s2467_s10, %s2460_s9 }
  0x7f   : > { %p2464_p4 = pneg %p2463_p1  ;;  %p2470_p0 = por %p2469_p12, %p2468_p5 }
  0x81   : > { %p2471_p2 = pnand %p2470_p0, %p2464_p4 }
  0x83   : > { %2474 = shalt.err (!%p2471_p2)
}
  0x84   : > { %s2532_s12 = smov 1024   ;;  %s2533_s14 = smov 64  }
  0x85   : > { %2283 = dma.hbm_to_vmem [thread:$0]  (!%p2730_p8), %s2728_s13, 65536, %s2734_s18, %s2736_s26, %s2532_s12, %s2532_s12, %s2533_s14  }
  0x86   : > { %p3364_p6 = scmp.ne.s32.totalorder %s3360_s28, 0 }
  0x87   : > { %p3365_p13 = scmp.eq.s32.totalorder (!%p3364_p6), %s2592_s5, 0 }
  0x88   : > { %262 = sbr.rel (%p3364_p6) target bundleno = 815 (0x32f), region = 44 }
  0x8f   : > { %2492 = dma.done.wait (%p3365_p13), [#allocation6], 1024   ;;  %p3366_p3 = pmov %p3365_p13 }
  0x91   : > { %2494 = vsyncadd (%p3366_p3), [#allocation6], 4294966272  ;;  %p3367_p7 = pmov %p3366_p3 }
  0x92   : > { %p3368_p10 = pmov %p3366_p3 }
  0x93   : > { %2496 = dma.done.wait (%p3367_p7), [#allocation8], 1024  }
  0x94   : > { %2498 = vsyncadd (%p3368_p10), [#allocation8], 4294966272  ;;  %s272_s30 = sand.u32 1, %s2592_s5   ;;  %s274_s13 = sand.u32 1, %s2517_s24  }
  0x95   : > { %s1716_s15 = sshll.u32 %s274_s13, 12  ;;  %s273_s28 = scalar_lea.sflag [#allocation6], %s272_s30 }
  0x96   : > { %s2776_s16 = scalar_lea.vmem [#allocation9], %s1716_s15  ;;  %p3369_p8 = scmp.ne.s32.totalorder %s3359_s27, 0 }
  0x98   : > { %2500 = dma.done.wait (%p3369_p8), %s273_s28, 65536  }
  0x99   : > { %2502 = vsyncadd (%p3369_p8), %s273_s28, 4294901760  ;;  %p3370_p9 = pmov %p3366_p3 }
  0x9a   : > { %p3371_p11 = pmov %p3366_p3 }
  0x9b   : > { %2504 = dma.done.wait (%p3370_p9), [#allocation8], 128  }
  0x9c   : > { %2506 = vsyncadd (%p3371_p11), [#allocation8], 4294967168  ;;  %p3372_p1 = pmov %p3366_p3 }
  0x9e   : > { %2508 = dma.done.wait (%p3372_p1), [#allocation12], 128   ;;  %p3373_p4 = pmov %p3372_p1 }
  0x9f   : > { %p3374_p5 = scmp.ne.s32.totalorder %s2592_s5, 0 }
  0xa0   : > { %2510 = vsyncadd (%p3373_p4), [#allocation12], 4294967168  ;;  %v329_v1 = vld [vmem:[#allocation5] sm:$0xff] (!%p3374_p5)  ;;  %v330_v2 = vld [vmem:[#allocation5 + $0x8] sm:$0xff] (!%p3374_p5)  ;;  %vm345_vm0 = vcmask (!%p3374_p5), 850944   ;;  %v2534_v4 = vmov (!%p3374_p5), 0.0  }
  0xa1   : > { %312 = sbr.rel (%p3374_p5) target bundleno = 174 (0xae), region = 68  ;;  %v331_v3 = vld [vmem:[#allocation5 + $0x10] sm:$0xff] (!%p3374_p5)  ;;  %320 = vst [vmem:[#allocation2 + $0x38] sm:$0xff] (!%p3374_p5), %v2534_v4  ;;  %328 = vst [vmem:[#allocation2 + $0x78] sm:$0xff] (!%p3374_p5), %v2534_v4  ;;  %v332_v5 = vld [vmem:[#allocation5 + $0x18] sm:$0xff] (!%p3374_p5) }
  0xa2   : > { %365 = vst [vmem:[#allocation3] sm:$0xff] (!%p3374_p5), %v2534_v4  ;;  %366 = vst [vmem:[#allocation3 + $0x8] sm:$0xff] (!%p3374_p5), %v2534_v4  ;;  %v337_v6 = vld [vmem:[#allocation5 + $0x20] sm:$0xff] (!%p3374_p5)  ;;  %v338_v7 = vld [vmem:[#allocation5 + $0x28] sm:$0xff] (!%p3374_p5) }
  0xa3   : > { %367 = vst [vmem:[#allocation3 + $0x10] sm:$0xff] (!%p3374_p5), %v2534_v4  ;;  %368 = vst [vmem:[#allocation3 + $0x18] sm:$0xff] (!%p3374_p5), %v2534_v4  ;;  %v339_v8 = vld [vmem:[#allocation5 + $0x30] sm:$0xff] (!%p3374_p5)  ;;  %v340_v9 = vld [vmem:[#allocation5 + $0x38] sm:$0xff] (!%p3374_p5) }
  0xa4   : > { %369 = vst [vmem:[#allocation3 + $0x20] sm:$0xff] (!%p3374_p5), %v2534_v4  ;;  %370 = vst [vmem:[#allocation3 + $0x28] sm:$0xff] (!%p3374_p5), %v2534_v4  ;;  %v347_v10 = vld [vmem:[#allocation7] sm:$0xff] (!%p3374_p5)  ;;  %v348_v11 = vld [vmem:[#allocation7 + $0x8] sm:$0xff] (!%p3374_p5) }
  0xa5   : > { %371 = vst [vmem:[#allocation3 + $0x30] sm:$0xff] (!%p3374_p5), %v2534_v4  ;;  %372 = vst [vmem:[#allocation3 + $0x38] sm:$0xff] (!%p3374_p5), %v2534_v4  ;;  %v349_v12 = vld [vmem:[#allocation7 + $0x10] sm:$0xff] (!%p3374_p5)  ;;  %v350_v13 = vld [vmem:[#allocation7 + $0x18] sm:$0xff] (!%p3374_p5) }
  0xa6   : > { %333 = vst [vmem:[#allocation2] sm:$0xff] (!%p3374_p5), %v329_v1  ;;  %334 = vst [vmem:[#allocation2 + $0x8] sm:$0xff] (!%p3374_p5), %v330_v2  ;;  %v356_v14 = vld [vmem:[#allocation7 + $0x20] sm:$0xff] (!%p3374_p5)  ;;  %v357_v15 = vld [vmem:[#allocation7 + $0x28] sm:$0xff] (!%p3374_p5) }
  0xa7   : > { %335 = vst [vmem:[#allocation2 + $0x10] sm:$0xff] (!%p3374_p5), %v331_v3  ;;  %336 = vst [vmem:[#allocation2 + $0x18] sm:$0xff] (!%p3374_p5), %v332_v5  ;;  %v358_v16 = vld [vmem:[#allocation7 + $0x30] sm:$0xff] (!%p3374_p5)  ;;  %v359_v17 = vld [vmem:[#allocation7 + $0x38] sm:$0xff] (!%p3374_p5) }
  0xa8   : > { %342 = vst [vmem:[#allocation2 + $0x20] sm:$0xff] %v337_v6  ;;  %343 = vst [vmem:[#allocation2 + $0x28] sm:$0xff] %v338_v7 }
  0xa9   : > { %344 = vst [vmem:[#allocation2 + $0x30] sm:$0xff] %v339_v8  ;;  %346 = vst.msk [vmem:[#allocation2 + $0x38] sm:$0xff] %vm345_vm0, %v340_v9 }
  0xaa   : > { %352 = vst [vmem:[#allocation2 + $0x40] sm:$0xff] %v347_v10  ;;  %353 = vst [vmem:[#allocation2 + $0x48] sm:$0xff] %v348_v11 }
  0xab   : > { %354 = vst [vmem:[#allocation2 + $0x50] sm:$0xff] %v349_v12  ;;  %355 = vst [vmem:[#allocation2 + $0x58] sm:$0xff] %v350_v13 }
  0xac   : > { %361 = vst [vmem:[#allocation2 + $0x60] sm:$0xff] %v356_v14  ;;  %362 = vst [vmem:[#allocation2 + $0x68] sm:$0xff] %v357_v15 }
  0xad   : > { %363 = vst [vmem:[#allocation2 + $0x70] sm:$0xff] %v358_v16  ;;  %364 = vst.msk [vmem:[#allocation2 + $0x78] sm:$0xff] %vm345_vm0, %v359_v17 }
  0xae PF: > { %v389_v18 = vld [vmem:[%s2776_s16 + $0x8] sm:$0xff]  ;;  %v391_v20 = vld [vmem:[%s2776_s16 + $0x18] sm:$0xff]  ;;  %v388_v23 = vld [vmem:[%s2776_s16] sm:$0xff]  ;;  %s1728_s27 = sshll.u32 %s2592_s5, 5  ;;  %p1722_p12 = scmp.ne.s32.totalorder %s2592_s5, 3 }
  0xaf   : > { %v397_v19 = vld [vmem:[%s2776_s16 + $0x48] sm:$0xff]  ;;  %v399_v22 = vld [vmem:[%s2776_s16 + $0x58] sm:$0xff]  ;;  %v396_v24 = vld [vmem:[%s2776_s16 + $0x40] sm:$0xff]  ;;  %s2893_s18 = scalar_lea.vmem [#allocation2], %s1728_s27  ;;  %vm1621_vm1 = vcmask (!%p1722_p12), 7168  }
  0xb0   : > { %v1729_v21 = vpack.c.bf16 %v397_v19, %v389_v18  ;;  %v1857_v25 = vpack.c.bf16 %v399_v22, %v391_v20  ;;  %v1731_v26 = vpack.c.bf16 %v396_v24, %v388_v23  ;;  %v390_v27 = vld [vmem:[%s2776_s16 + $0x10] sm:$0xff]  ;;  %v405_v29 = vld [vmem:[%s2776_s16 + $0x88] sm:$0xff]  ;;  %v407_v32 = vld [vmem:[%s2776_s16 + $0x98] sm:$0xff] }
  0xb1   : > { %v398_v28 = vld [vmem:[%s2776_s16 + $0x50] sm:$0xff]  ;;  %v413_v31 = vld [vmem:[%s2776_s16 + $0xc8] sm:$0xff]  ;;  %v415_v33 = vld [vmem:[%s2776_s16 + $0xd8] sm:$0xff] }
  0xb2   : > { %1730 = vmatprep.subr.bf16.mxu0 %v1729_v21  ;;  %v1859_v30 = vpack.c.bf16 %v398_v28, %v390_v27  ;;  %1858 = vmatprep.subr.bf16.mxu1 %v1857_v25  ;;  %v1733_v34 = vpack.c.bf16 %v413_v31, %v405_v29  ;;  %v1861_v35 = vpack.c.bf16 %v415_v33, %v407_v32  ;;  %v404_v36 = vld [vmem:[%s2776_s16 + $0x80] sm:$0xff]  ;;  %v406_v38 = vld [vmem:[%s2776_s16 + $0x90] sm:$0xff]  ;;  %v421_v41 = vld [vmem:[%s2776_s16 + $0x108] sm:$0xff] }
  0xb3   : > { %1732 = vmatpush1.bf16.msra.mxu0 %v1731_v26  ;;  %v412_v37 = vld [vmem:[%s2776_s16 + $0xc0] sm:$0xff]  ;;  %v414_v40 = vld [vmem:[%s2776_s16 + $0xd0] sm:$0xff]  ;;  %v429_v42 = vld [vmem:[%s2776_s16 + $0x148] sm:$0xff] }
  0xb4   : > { %1860 = vmatpush1.bf16.msra.mxu1 %v1859_v30  ;;  %v1735_v39 = vpack.c.bf16 %v412_v37, %v404_v36  ;;  %1734 = vmatprep.subr.bf16.mxu0 %v1733_v34  ;;  %v1863_v43 = vpack.c.bf16 %v414_v40, %v406_v38  ;;  %v1737_v44 = vpack.c.bf16 %v429_v42, %v421_v41  ;;  %v423_v45 = vld [vmem:[%s2776_s16 + $0x118] sm:$0xff]  ;;  %v420_v47 = vld [vmem:[%s2776_s16 + $0x100] sm:$0xff]  ;;  %v422_v50 = vld [vmem:[%s2776_s16 + $0x110] sm:$0xff] }
  0xb5   : > { %1862 = vmatprep.subr.bf16.mxu1 %v1861_v35  ;;  %v431_v46 = vld [vmem:[%s2776_s16 + $0x158] sm:$0xff]  ;;  %v428_v49 = vld [vmem:[%s2776_s16 + $0x140] sm:$0xff]  ;;  %v430_v51 = vld [vmem:[%s2776_s16 + $0x150] sm:$0xff] }
  0xb6   : > { %v1865_v48 = vpack.c.bf16 %v431_v46, %v423_v45  ;;  %v1739_v52 = vpack.c.bf16 %v428_v49, %v420_v47  ;;  %v437_v53 = vld [vmem:[%s2776_s16 + $0x188] sm:$0xff]  ;;  %v439_v55 = vld [vmem:[%s2776_s16 + $0x198] sm:$0xff]  ;;  %v1867_v56 = vpack.c.bf16 %v430_v51, %v422_v50  ;;  %v436_v59 = vld [vmem:[%s2776_s16 + $0x180] sm:$0xff] }
  0xb7   : > { %1736 = vmatpush1.bf16.msra.mxu0 %v1735_v39  ;;  %v445_v54 = vld [vmem:[%s2776_s16 + $0x1c8] sm:$0xff]  ;;  %v447_v58 = vld [vmem:[%s2776_s16 + $0x1d8] sm:$0xff]  ;;  %v444_v60 = vld [vmem:[%s2776_s16 + $0x1c0] sm:$0xff] }
  0xb8   : > { %1864 = vmatpush1.bf16.msra.mxu1 %v1863_v43  ;;  %1738 = vmatprep.subr.bf16.mxu0 %v1737_v44  ;;  %v1741_v57 = vpack.c.bf16 %v445_v54, %v437_v53  ;;  %v1869_v61 = vpack.c.bf16 %v447_v58, %v439_v55  ;;  %v438_v62 = vld [vmem:[%s2776_s16 + $0x190] sm:$0xff]  ;;  %v453_v0 = vld [vmem:[%s2776_s16 + $0x208] sm:$0xff]  ;;  %v455_v2 = vld [vmem:[%s2776_s16 + $0x218] sm:$0xff]  ;;  %v1743_v4 = vpack.c.bf16 %v444_v60, %v436_v59 }
  0xb9   : > { %1866 = vmatprep.subr.bf16.mxu1 %v1865_v48  ;;  %v446_v63 = vld [vmem:[%s2776_s16 + $0x1d0] sm:$0xff]  ;;  %v461_v1 = vld [vmem:[%s2776_s16 + $0x248] sm:$0xff]  ;;  %v463_v3 = vld [vmem:[%s2776_s16 + $0x258] sm:$0xff] }
  0xba   : > { %v1871_v5 = vpack.c.bf16 %v446_v63, %v438_v62  ;;  %v1745_v6 = vpack.c.bf16 %v461_v1, %v453_v0  ;;  %v452_v7 = vld [vmem:[%s2776_s16 + $0x200] sm:$0xff]  ;;  %v454_v9 = vld [vmem:[%s2776_s16 + $0x210] sm:$0xff]  ;;  %v1873_v10 = vpack.c.bf16 %v463_v3, %v455_v2  ;;  %v469_v12 = vld [vmem:[%s2776_s16 + $0x288] sm:$0xff] }
  0xbb   : > { %1740 = vmatpush1.bf16.msra.mxu0 %v1739_v52  ;;  %v460_v8 = vld [vmem:[%s2776_s16 + $0x240] sm:$0xff]  ;;  %v462_v11 = vld [vmem:[%s2776_s16 + $0x250] sm:$0xff]  ;;  %v477_v13 = vld [vmem:[%s2776_s16 + $0x2c8] sm:$0xff] }
  0xbc   : > { %1868 = vmatpush1.bf16.msra.mxu1 %v1867_v56  ;;  %1742 = vmatprep.subr.bf16.mxu0 %v1741_v57  ;;  %v471_v14 = vld [vmem:[%s2776_s16 + $0x298] sm:$0xff]  ;;  %v1747_v16 = vpack.c.bf16 %v460_v8, %v452_v7  ;;  %v1875_v17 = vpack.c.bf16 %v462_v11, %v454_v9  ;;  %v1749_v18 = vpack.c.bf16 %v477_v13, %v469_v12  ;;  %v468_v19 = vld [vmem:[%s2776_s16 + $0x280] sm:$0xff]  ;;  %v470_v21 = vld [vmem:[%s2776_s16 + $0x290] sm:$0xff] }
  0xbd   : > { %1870 = vmatprep.subr.bf16.mxu1 %v1869_v61  ;;  %v479_v15 = vld [vmem:[%s2776_s16 + $0x2d8] sm:$0xff]  ;;  %v476_v20 = vld [vmem:[%s2776_s16 + $0x2c0] sm:$0xff]  ;;  %v478_v23 = vld [vmem:[%s2776_s16 + $0x2d0] sm:$0xff] }
  0xbe   : > { %v1877_v22 = vpack.c.bf16 %v479_v15, %v471_v14  ;;  %v485_v24 = vld [vmem:[%s2776_s16 + $0x308] sm:$0xff]  ;;  %v487_v26 = vld [vmem:[%s2776_s16 + $0x318] sm:$0xff]  ;;  %v1751_v28 = vpack.c.bf16 %v476_v20, %v468_v19  ;;  %v1879_v29 = vpack.c.bf16 %v478_v23, %v470_v21  ;;  %v484_v31 = vld [vmem:[%s2776_s16 + $0x300] sm:$0xff] }
  0xbf   : > { %1744 = vmatpush1.bf16.msra.mxu0 %v1743_v4  ;;  %v493_v25 = vld [vmem:[%s2776_s16 + $0x348] sm:$0xff]  ;;  %v495_v27 = vld [vmem:[%s2776_s16 + $0x358] sm:$0xff]  ;;  %v492_v32 = vld [vmem:[%s2776_s16 + $0x340] sm:$0xff] }
  0xc0   : > { %1872 = vmatpush1.bf16.msra.mxu1 %v1871_v5  ;;  %1746 = vmatprep.subr.bf16.mxu0 %v1745_v6  ;;  %v1753_v30 = vpack.c.bf16 %v493_v25, %v485_v24  ;;  %v486_v33 = vld [vmem:[%s2776_s16 + $0x310] sm:$0xff]  ;;  %v1881_v34 = vpack.c.bf16 %v495_v27, %v487_v26  ;;  %v501_v36 = vld [vmem:[%s2776_s16 + $0x388] sm:$0xff]  ;;  %v503_v38 = vld [vmem:[%s2776_s16 + $0x398] sm:$0xff]  ;;  %v1755_v40 = vpack.c.bf16 %v492_v32, %v484_v31 }
  0xc1   : > { %1874 = vmatprep.subr.bf16.mxu1 %v1873_v10  ;;  %v494_v35 = vld [vmem:[%s2776_s16 + $0x350] sm:$0xff]  ;;  %v509_v37 = vld [vmem:[%s2776_s16 + $0x3c8] sm:$0xff]  ;;  %v511_v39 = vld [vmem:[%s2776_s16 + $0x3d8] sm:$0xff] }
  0xc2   : > { %v1883_v41 = vpack.c.bf16 %v494_v35, %v486_v33  ;;  %v1757_v42 = vpack.c.bf16 %v509_v37, %v501_v36  ;;  %v500_v43 = vld [vmem:[%s2776_s16 + $0x380] sm:$0xff]  ;;  %v502_v45 = vld [vmem:[%s2776_s16 + $0x390] sm:$0xff]  ;;  %v1885_v46 = vpack.c.bf16 %v511_v39, %v503_v38  ;;  %v517_v48 = vld [vmem:[%s2776_s16 + $0x408] sm:$0xff] }
  0xc3   : > { %1748 = vmatpush1.bf16.msra.mxu0 %v1747_v16  ;;  %v508_v44 = vld [vmem:[%s2776_s16 + $0x3c0] sm:$0xff]  ;;  %v510_v47 = vld [vmem:[%s2776_s16 + $0x3d0] sm:$0xff]  ;;  %v525_v49 = vld [vmem:[%s2776_s16 + $0x448] sm:$0xff] }
  0xc4   : > { %1876 = vmatpush1.bf16.msra.mxu1 %v1875_v17  ;;  %1750 = vmatprep.subr.bf16.mxu0 %v1749_v18  ;;  %v519_v50 = vld [vmem:[%s2776_s16 + $0x418] sm:$0xff]  ;;  %v1759_v52 = vpack.c.bf16 %v508_v44, %v500_v43  ;;  %v1887_v53 = vpack.c.bf16 %v510_v47, %v502_v45  ;;  %v1761_v54 = vpack.c.bf16 %v525_v49, %v517_v48  ;;  %v516_v55 = vld [vmem:[%s2776_s16 + $0x400] sm:$0xff]  ;;  %v518_v57 = vld [vmem:[%s2776_s16 + $0x410] sm:$0xff] }
  0xc5   : > { %1878 = vmatprep.subr.bf16.mxu1 %v1877_v22  ;;  %v527_v51 = vld [vmem:[%s2776_s16 + $0x458] sm:$0xff]  ;;  %v524_v56 = vld [vmem:[%s2776_s16 + $0x440] sm:$0xff]  ;;  %v526_v59 = vld [vmem:[%s2776_s16 + $0x450] sm:$0xff] }
  0xc6   : > { %v1889_v58 = vpack.c.bf16 %v527_v51, %v519_v50  ;;  %v533_v60 = vld [vmem:[%s2776_s16 + $0x488] sm:$0xff]  ;;  %v535_v62 = vld [vmem:[%s2776_s16 + $0x498] sm:$0xff]  ;;  %v1763_v0 = vpack.c.bf16 %v524_v56, %v516_v55  ;;  %v1891_v1 = vpack.c.bf16 %v526_v59, %v518_v57  ;;  %v532_v3 = vld [vmem:[%s2776_s16 + $0x480] sm:$0xff] }
  0xc7   : > { %1752 = vmatpush1.bf16.msra.mxu0 %v1751_v28  ;;  %v541_v61 = vld [vmem:[%s2776_s16 + $0x4c8] sm:$0xff]  ;;  %v543_v63 = vld [vmem:[%s2776_s16 + $0x4d8] sm:$0xff]  ;;  %v540_v4 = vld [vmem:[%s2776_s16 + $0x4c0] sm:$0xff] }
  0xc8   : > { %1880 = vmatpush1.bf16.msra.mxu1 %v1879_v29  ;;  %1754 = vmatprep.subr.bf16.mxu0 %v1753_v30  ;;  %v1765_v2 = vpack.c.bf16 %v541_v61, %v533_v60  ;;  %v534_v5 = vld [vmem:[%s2776_s16 + $0x490] sm:$0xff]  ;;  %v1893_v6 = vpack.c.bf16 %v543_v63, %v535_v62  ;;  %v549_v8 = vld [vmem:[%s2776_s16 + $0x508] sm:$0xff]  ;;  %v551_v10 = vld [vmem:[%s2776_s16 + $0x518] sm:$0xff]  ;;  %v1767_v12 = vpack.c.bf16 %v540_v4, %v532_v3 }
  0xc9   : > { %1882 = vmatprep.subr.bf16.mxu1 %v1881_v34  ;;  %v542_v7 = vld [vmem:[%s2776_s16 + $0x4d0] sm:$0xff]  ;;  %v557_v9 = vld [vmem:[%s2776_s16 + $0x548] sm:$0xff]  ;;  %v559_v11 = vld [vmem:[%s2776_s16 + $0x558] sm:$0xff] }
  0xca   : > { %v1895_v13 = vpack.c.bf16 %v542_v7, %v534_v5  ;;  %v1769_v14 = vpack.c.bf16 %v557_v9, %v549_v8  ;;  %v548_v15 = vld [vmem:[%s2776_s16 + $0x500] sm:$0xff]  ;;  %v550_v17 = vld [vmem:[%s2776_s16 + $0x510] sm:$0xff]  ;;  %v1897_v18 = vpack.c.bf16 %v559_v11, %v551_v10  ;;  %v565_v20 = vld [vmem:[%s2776_s16 + $0x588] sm:$0xff] }
  0xcb   : > { %1756 = vmatpush1.bf16.msra.mxu0 %v1755_v40  ;;  %v556_v16 = vld [vmem:[%s2776_s16 + $0x540] sm:$0xff]  ;;  %v558_v19 = vld [vmem:[%s2776_s16 + $0x550] sm:$0xff]  ;;  %v573_v21 = vld [vmem:[%s2776_s16 + $0x5c8] sm:$0xff] }
  0xcc   : > { %1884 = vmatpush1.bf16.msra.mxu1 %v1883_v41  ;;  %1758 = vmatprep.subr.bf16.mxu0 %v1757_v42  ;;  %v567_v22 = vld [vmem:[%s2776_s16 + $0x598] sm:$0xff]  ;;  %v1771_v24 = vpack.c.bf16 %v556_v16, %v548_v15  ;;  %v564_v25 = vld [vmem:[%s2776_s16 + $0x580] sm:$0xff]  ;;  %v1899_v26 = vpack.c.bf16 %v558_v19, %v550_v17  ;;  %v1773_v27 = vpack.c.bf16 %v573_v21, %v565_v20  ;;  %v566_v29 = vld [vmem:[%s2776_s16 + $0x590] sm:$0xff] }
  0xcd   : > { %1886 = vmatprep.subr.bf16.mxu1 %v1885_v46  ;;  %v575_v23 = vld [vmem:[%s2776_s16 + $0x5d8] sm:$0xff]  ;;  %v572_v28 = vld [vmem:[%s2776_s16 + $0x5c0] sm:$0xff]  ;;  %v574_v30 = vld [vmem:[%s2776_s16 + $0x5d0] sm:$0xff] }
  0xce   : > { %v1901_v31 = vpack.c.bf16 %v575_v23, %v567_v22  ;;  %v581_v32 = vld [vmem:[%s2776_s16 + $0x608] sm:$0xff]  ;;  %v583_v35 = vld [vmem:[%s2776_s16 + $0x618] sm:$0xff]  ;;  %v1775_v37 = vpack.c.bf16 %v572_v28, %v564_v25  ;;  %v1903_v38 = vpack.c.bf16 %v574_v30, %v566_v29  ;;  %v580_v40 = vld [vmem:[%s2776_s16 + $0x600] sm:$0xff] }
  0xcf   : > { %1760 = vmatpush1.bf16.msra.mxu0 %v1759_v52  ;;  %v589_v33 = vld [vmem:[%s2776_s16 + $0x648] sm:$0xff]  ;;  %v591_v36 = vld [vmem:[%s2776_s16 + $0x658] sm:$0xff]  ;;  %v588_v41 = vld [vmem:[%s2776_s16 + $0x640] sm:$0xff] }
  0xd0   : > { %1888 = vmatpush1.bf16.msra.mxu1 %v1887_v53  ;;  %1762 = vmatprep.subr.bf16.mxu0 %v1761_v54  ;;  %v2896_v34 = vld [vmem:[%s2893_s18 + $0x8] sm:$0xff]  ;;  %v1777_v39 = vpack.c.bf16 %v589_v33, %v581_v32  ;;  %v582_v42 = vld [vmem:[%s2776_s16 + $0x610] sm:$0xff]  ;;  %v1905_v43 = vpack.c.bf16 %v591_v36, %v583_v35  ;;  %v599_v47 = vld [vmem:[%s2776_s16 + $0x698] sm:$0xff]  ;;  %v1779_v49 = vpack.c.bf16 %v588_v41, %v580_v40 }
  0xd1   : > { %1890 = vmatprep.subr.bf16.mxu1 %v1889_v58  ;;  %964 = vmatprep.mubr.f32.mxu0 %v2896_v34  ;;  %v590_v44 = vld [vmem:[%s2776_s16 + $0x650] sm:$0xff]  ;;  %v597_v45 = vld [vmem:[%s2776_s16 + $0x688] sm:$0xff]  ;;  %v607_v48 = vld [vmem:[%s2776_s16 + $0x6d8] sm:$0xff] }
  0xd2   : > { %1106 = vmatprep.mubr.f32.mxu1 %v2896_v34  ;;  %v605_v46 = vld [vmem:[%s2776_s16 + $0x6c8] sm:$0xff]  ;;  %v1907_v50 = vpack.c.bf16 %v590_v44, %v582_v42  ;;  %v596_v52 = vld [vmem:[%s2776_s16 + $0x680] sm:$0xff]  ;;  %v598_v54 = vld [vmem:[%s2776_s16 + $0x690] sm:$0xff]  ;;  %v1909_v55 = vpack.c.bf16 %v607_v48, %v599_v47 }
  0xd3   : > { %1764 = vmatpush1.bf16.msra.mxu0 %v1763_v0  ;;  %v1781_v51 = vpack.c.bf16 %v605_v46, %v597_v45  ;;  %v604_v53 = vld [vmem:[%s2776_s16 + $0x6c0] sm:$0xff]  ;;  %v606_v56 = vld [vmem:[%s2776_s16 + $0x6d0] sm:$0xff]  ;;  %v613_v57 = vld [vmem:[%s2776_s16 + $0x708] sm:$0xff] }
  0xd4   : > { %1892 = vmatpush1.bf16.msra.mxu1 %v1891_v1  ;;  %1766 = vmatprep.subr.bf16.mxu0 %v1765_v2  ;;  %v621_v58 = vld [vmem:[%s2776_s16 + $0x748] sm:$0xff]  ;;  %v615_v59 = vld [vmem:[%s2776_s16 + $0x718] sm:$0xff]  ;;  %v1783_v61 = vpack.c.bf16 %v604_v53, %v596_v52  ;;  %v1911_v62 = vpack.c.bf16 %v606_v56, %v598_v54  ;;  %v612_v0 = vld [vmem:[%s2776_s16 + $0x700] sm:$0xff] }
  0xd5   : > { %1894 = vmatprep.subr.bf16.mxu1 %v1893_v6  ;;  %v623_v60 = vld [vmem:[%s2776_s16 + $0x758] sm:$0xff]  ;;  %v1785_v63 = vpack.c.bf16 %v621_v58, %v613_v57  ;;  %v620_v1 = vld [vmem:[%s2776_s16 + $0x740] sm:$0xff]  ;;  %v614_v2 = vld [vmem:[%s2776_s16 + $0x710] sm:$0xff] }
  0xd6   : > { %v1913_v3 = vpack.c.bf16 %v623_v60, %v615_v59  ;;  %v622_v4 = vld [vmem:[%s2776_s16 + $0x750] sm:$0xff]  ;;  %v629_v5 = vld [vmem:[%s2776_s16 + $0x788] sm:$0xff]  ;;  %v631_v7 = vld [vmem:[%s2776_s16 + $0x798] sm:$0xff]  ;;  %v1787_v9 = vpack.c.bf16 %v620_v1, %v612_v0 }
  0xd7   : > { %1768 = vmatpush1.bf16.msra.mxu0 %v1767_v12  ;;  %v637_v6 = vld [vmem:[%s2776_s16 + $0x7c8] sm:$0xff]  ;;  %v639_v8 = vld [vmem:[%s2776_s16 + $0x7d8] sm:$0xff]  ;;  %v1915_v10 = vpack.c.bf16 %v622_v4, %v614_v2  ;;  %v628_v12 = vld [vmem:[%s2776_s16 + $0x780] sm:$0xff] }
  0xd8   : > { %1896 = vmatpush1.bf16.msra.mxu1 %v1895_v13  ;;  %1770 = vmatprep.subr.bf16.mxu0 %v1769_v14  ;;  %v1789_v11 = vpack.c.bf16 %v637_v6, %v629_v5  ;;  %v636_v13 = vld [vmem:[%s2776_s16 + $0x7c0] sm:$0xff]  ;;  %v630_v14 = vld [vmem:[%s2776_s16 + $0x790] sm:$0xff]  ;;  %v1917_v15 = vpack.c.bf16 %v639_v8, %v631_v7  ;;  %v645_v17 = vld [vmem:[%s2776_s16 + $0x808] sm:$0xff] }
  0xd9   : > { %1898 = vmatprep.subr.bf16.mxu1 %v1897_v18  ;;  %v638_v16 = vld [vmem:[%s2776_s16 + $0x7d0] sm:$0xff]  ;;  %v653_v18 = vld [vmem:[%s2776_s16 + $0x848] sm:$0xff]  ;;  %v647_v19 = vld [vmem:[%s2776_s16 + $0x818] sm:$0xff]  ;;  %v1791_v21 = vpack.c.bf16 %v636_v13, %v628_v12 }
  0xda   : > { %v655_v20 = vld [vmem:[%s2776_s16 + $0x858] sm:$0xff]  ;;  %v1919_v22 = vpack.c.bf16 %v638_v16, %v630_v14  ;;  %v1793_v23 = vpack.c.bf16 %v653_v18, %v645_v17  ;;  %v652_v25 = vld [vmem:[%s2776_s16 + $0x840] sm:$0xff]  ;;  %v654_v28 = vld [vmem:[%s2776_s16 + $0x850] sm:$0xff] }
  0xdb   : > { %1772 = vmatpush1.bf16.msra.mxu0 %v1771_v24  ;;  %v644_v24 = vld [vmem:[%s2776_s16 + $0x800] sm:$0xff]  ;;  %v661_v29 = vld [vmem:[%s2776_s16 + $0x888] sm:$0xff]  ;;  %v671_v32 = vld [vmem:[%s2776_s16 + $0x8d8] sm:$0xff] }
  0xdc   : > { %1900 = vmatpush1.bf16.msra.mxu1 %v1899_v26  ;;  %1774 = vmatprep.subr.bf16.mxu0 %v1773_v27  ;;  %v646_v26 = vld [vmem:[%s2776_s16 + $0x810] sm:$0xff]  ;;  %v1921_v27 = vpack.c.bf16 %v655_v20, %v647_v19  ;;  %v669_v30 = vld [vmem:[%s2776_s16 + $0x8c8] sm:$0xff]  ;;  %v384_v33 = vld [vmem:[%s2893_s18] sm:$0xff]  ;;  %v1795_v35 = vpack.c.bf16 %v652_v25, %v644_v24 }
  0xdd   : > { %1902 = vmatprep.subr.bf16.mxu1 %v1901_v31  ;;  %v663_v31 = vld [vmem:[%s2776_s16 + $0x898] sm:$0xff]  ;;  %v1923_v36 = vpack.c.bf16 %v654_v28, %v646_v26  ;;  %v662_v40 = vld [vmem:[%s2776_s16 + $0x890] sm:$0xff]  ;;  %v685_v44 = vld [vmem:[%s2776_s16 + $0x948] sm:$0xff] }
  0xde   : > { %v1925_v41 = vpack.c.bf16 %v671_v32, %v663_v31  ;;  %v670_v42 = vld [vmem:[%s2776_s16 + $0x8d0] sm:$0xff]  ;;  %v679_v45 = vld [vmem:[%s2776_s16 + $0x918] sm:$0xff]  ;;  %v701_v56 = vld [vmem:[%s2776_s16 + $0x9c8] sm:$0xff] }
  0xdf   : > { %1776 = vmatpush1.bf16.msra.mxu0 %v1775_v37  ;;  %v1797_v37 = vpack.c.bf16 %v669_v30, %v661_v29  ;;  %v687_v46 = vld [vmem:[%s2776_s16 + $0x958] sm:$0xff]  ;;  %v1927_v48 = vpack.c.bf16 %v670_v42, %v662_v40  ;;  %v678_v52 = vld [vmem:[%s2776_s16 + $0x910] sm:$0xff]  ;;  %v717_v4 = vld [vmem:[%s2776_s16 + $0xa48] sm:$0xff] }
  0xe0   : > { %1904 = vmatpush1.bf16.msra.mxu1 %v1903_v38  ;;  %1778 = vmatprep.subr.bf16.mxu0 %v1777_v39  ;;  %v660_v38 = vld [vmem:[%s2776_s16 + $0x880] sm:$0xff]  ;;  %v1929_v53 = vpack.c.bf16 %v687_v46, %v679_v45  ;;  %v686_v54 = vld [vmem:[%s2776_s16 + $0x950] sm:$0xff]  ;;  %v695_v57 = vld [vmem:[%s2776_s16 + $0x998] sm:$0xff] }
  0xe1   : > { %1906 = vmatprep.subr.bf16.mxu1 %v1905_v43  ;;  %v668_v39 = vld [vmem:[%s2776_s16 + $0x8c0] sm:$0xff]  ;;  %v677_v43 = vld [vmem:[%s2776_s16 + $0x908] sm:$0xff]  ;;  %v703_v58 = vld [vmem:[%s2776_s16 + $0x9d8] sm:$0xff]  ;;  %v1931_v60 = vpack.c.bf16 %v686_v54, %v678_v52 }
  0xe2   : > { %v1799_v47 = vpack.c.bf16 %v668_v39, %v660_v38  ;;  %v694_v0 = vld [vmem:[%s2776_s16 + $0x990] sm:$0xff]  ;;  %v1933_v1 = vpack.c.bf16 %v703_v58, %v695_v57  ;;  %v711_v5 = vld [vmem:[%s2776_s16 + $0xa18] sm:$0xff]  ;;  %v733_v16 = vld [vmem:[%s2776_s16 + $0xac8] sm:$0xff] }
  0xe3   : > { %1780 = vmatpush1.bf16.msra.mxu0 %v1779_v49  ;;  %v1801_v49 = vpack.c.bf16 %v685_v44, %v677_v43  ;;  %v702_v2 = vld [vmem:[%s2776_s16 + $0x9d0] sm:$0xff]  ;;  %v719_v6 = vld [vmem:[%s2776_s16 + $0xa58] sm:$0xff]  ;;  %v749_v28 = vld [vmem:[%s2776_s16 + $0xb48] sm:$0xff] }
  0xe4   : > { %1908 = vmatpush1.bf16.msra.mxu1 %v1907_v50  ;;  %1782 = vmatprep.subr.bf16.mxu0 %v1781_v51  ;;  %v676_v50 = vld [vmem:[%s2776_s16 + $0x900] sm:$0xff]  ;;  %v1935_v8 = vpack.c.bf16 %v702_v2, %v694_v0  ;;  %v710_v12 = vld [vmem:[%s2776_s16 + $0xa10] sm:$0xff]  ;;  %v1937_v13 = vpack.c.bf16 %v719_v6, %v711_v5  ;;  %v727_v17 = vld [vmem:[%s2776_s16 + $0xa98] sm:$0xff] }
  0xe5   : > { %1910 = vmatprep.subr.bf16.mxu1 %v1909_v55  ;;  %v684_v51 = vld [vmem:[%s2776_s16 + $0x940] sm:$0xff]  ;;  %v693_v55 = vld [vmem:[%s2776_s16 + $0x988] sm:$0xff]  ;;  %v718_v14 = vld [vmem:[%s2776_s16 + $0xa50] sm:$0xff] }
  0xe6   : > { %v1803_v59 = vpack.c.bf16 %v684_v51, %v676_v50  ;;  %v735_v18 = vld [vmem:[%s2776_s16 + $0xad8] sm:$0xff]  ;;  %v1939_v20 = vpack.c.bf16 %v718_v14, %v710_v12  ;;  %v726_v24 = vld [vmem:[%s2776_s16 + $0xa90] sm:$0xff]  ;;  %v740_v32 = vld [vmem:[%s2776_s16 + $0xb00] sm:$0xff] }
  0xe7   : > { %1784 = vmatpush1.bf16.msra.mxu0 %v1783_v61  ;;  %v1805_v61 = vpack.c.bf16 %v701_v56, %v693_v55  ;;  %v1941_v25 = vpack.c.bf16 %v735_v18, %v727_v17  ;;  %v734_v26 = vld [vmem:[%s2776_s16 + $0xad0] sm:$0xff]  ;;  %v743_v29 = vld [vmem:[%s2776_s16 + $0xb18] sm:$0xff]  ;;  %v757_v40 = vld [vmem:[%s2776_s16 + $0xb88] sm:$0xff] }
  0xe8   : > { %1912 = vmatpush1.bf16.msra.mxu1 %v1911_v62  ;;  %1786 = vmatprep.subr.bf16.mxu0 %v1785_v63  ;;  %v692_v62 = vld [vmem:[%s2776_s16 + $0x980] sm:$0xff]  ;;  %v751_v30 = vld [vmem:[%s2776_s16 + $0xb58] sm:$0xff]  ;;  %v750_v38 = vld [vmem:[%s2776_s16 + $0xb50] sm:$0xff] }
  0xe9   : > { %1914 = vmatprep.subr.bf16.mxu1 %v1913_v3  ;;  %v700_v63 = vld [vmem:[%s2776_s16 + $0x9c0] sm:$0xff]  ;;  %v709_v3 = vld [vmem:[%s2776_s16 + $0xa08] sm:$0xff]  ;;  %v1945_v39 = vpack.c.bf16 %v751_v30, %v743_v29  ;;  %v2990_v42 = vld [vmem:[%s2893_s18 + $0x18] sm:$0xff] }
  0xea   : > { %v1807_v7 = vpack.c.bf16 %v700_v63, %v692_v62  ;;  %v759_v43 = vld [vmem:[%s2776_s16 + $0xb98] sm:$0xff]  ;;  %v758_v50 = vld [vmem:[%s2776_s16 + $0xb90] sm:$0xff]  ;;  %v781_v54 = vld [vmem:[%s2776_s16 + $0xc48] sm:$0xff] }
  0xeb   : > { %1788 = vmatpush1.bf16.msra.mxu0 %v1787_v9  ;;  %v1809_v9 = vpack.c.bf16 %v717_v4, %v709_v3  ;;  %v767_v44 = vld [vmem:[%s2776_s16 + $0xbd8] sm:$0xff]  ;;  %v766_v52 = vld [vmem:[%s2776_s16 + $0xbd0] sm:$0xff]  ;;  %v797_v2 = vld [vmem:[%s2776_s16 + $0xcc8] sm:$0xff] }
  0xec   : > { %1916 = vmatpush1.bf16.msra.mxu1 %v1915_v10  ;;  %1790 = vmatprep.subr.bf16.mxu0 %v1789_v11  ;;  %v708_v10 = vld [vmem:[%s2776_s16 + $0xa00] sm:$0xff]  ;;  %v1949_v51 = vpack.c.bf16 %v767_v44, %v759_v43  ;;  %v775_v55 = vld [vmem:[%s2776_s16 + $0xc18] sm:$0xff]  ;;  %v1951_v58 = vpack.c.bf16 %v766_v52, %v758_v50  ;;  %v774_v62 = vld [vmem:[%s2776_s16 + $0xc10] sm:$0xff] }
  0xed   : > { %1918 = vmatprep.subr.bf16.mxu1 %v1917_v15  ;;  %v716_v11 = vld [vmem:[%s2776_s16 + $0xa40] sm:$0xff]  ;;  %v725_v15 = vld [vmem:[%s2776_s16 + $0xa88] sm:$0xff]  ;;  %v783_v56 = vld [vmem:[%s2776_s16 + $0xc58] sm:$0xff] }
  0xee   : > { %v1811_v19 = vpack.c.bf16 %v716_v11, %v708_v10  ;;  %v1953_v63 = vpack.c.bf16 %v783_v56, %v775_v55  ;;  %v782_v0 = vld [vmem:[%s2776_s16 + $0xc50] sm:$0xff]  ;;  %v791_v3 = vld [vmem:[%s2776_s16 + $0xc98] sm:$0xff]  ;;  %v813_v14 = vld [vmem:[%s2776_s16 + $0xd48] sm:$0xff] }
  0xef   : > { %1792 = vmatpush1.bf16.msra.mxu0 %v1791_v21  ;;  %v1813_v21 = vpack.c.bf16 %v733_v16, %v725_v15  ;;  %v799_v4 = vld [vmem:[%s2776_s16 + $0xcd8] sm:$0xff]  ;;  %v1955_v6 = vpack.c.bf16 %v782_v0, %v774_v62  ;;  %v790_v10 = vld [vmem:[%s2776_s16 + $0xc90] sm:$0xff]  ;;  %v861_v52 = vld [vmem:[%s2776_s16 + $0xec8] sm:$0xff] }
  0xf0   : > { %1920 = vmatpush1.bf16.msra.mxu1 %v1919_v22  ;;  %1794 = vmatprep.subr.bf16.mxu0 %v1793_v23  ;;  %v724_v22 = vld [vmem:[%s2776_s16 + $0xa80] sm:$0xff]  ;;  %v1957_v11 = vpack.c.bf16 %v799_v4, %v791_v3  ;;  %v798_v12 = vld [vmem:[%s2776_s16 + $0xcd0] sm:$0xff]  ;;  %v807_v15 = vld [vmem:[%s2776_s16 + $0xd18] sm:$0xff] }
  0xf1   : > { %1922 = vmatprep.subr.bf16.mxu1 %v1921_v27  ;;  %v732_v23 = vld [vmem:[%s2776_s16 + $0xac0] sm:$0xff]  ;;  %v741_v27 = vld [vmem:[%s2776_s16 + $0xb08] sm:$0xff]  ;;  %v815_v16 = vld [vmem:[%s2776_s16 + $0xd58] sm:$0xff]  ;;  %v1959_v18 = vpack.c.bf16 %v798_v12, %v790_v10 }
  0xf2   : > { %965 = vmatmul.mubr.f32.vlgmr.msra.gmra.mrb[0].mxu0 %v384_v33  ;;  %v1815_v31 = vpack.c.bf16 %v732_v23, %v724_v22  ;;  %v806_v22 = vld [vmem:[%s2776_s16 + $0xd10] sm:$0xff]  ;;  %v1961_v23 = vpack.c.bf16 %v815_v16, %v807_v15  ;;  %v877_v0 = vld [vmem:[%s2776_s16 + $0xf48] sm:$0xff] }
  0xf3   : > { %1796 = vmatpush1.bf16.msra.mxu0 %v1795_v35  ;;  %1107 = vmatmul.mubr.f32.vlgmr.msra.gmra.mrb[0].mxu1 %v384_v33  ;;  %v1943_v33 = vpack.c.bf16 %v734_v26, %v726_v24  ;;  %v1817_v35 = vpack.c.bf16 %v749_v28, %v741_v27  ;;  %v814_v24 = vld [vmem:[%s2776_s16 + $0xd50] sm:$0xff]  ;;  %v829_v26 = vld [vmem:[%s2776_s16 + $0xdc8] sm:$0xff]  ;;  %v823_v27 = vld [vmem:[%s2776_s16 + $0xd98] sm:$0xff] }
  0xf4   : > { %1924 = vmatpush1.bf16.msra.mxu1 %v1923_v36  ;;  %1798 = vmatprep.subr.bf16.mxu0 %v1797_v37  ;;  %v748_v36 = vld [vmem:[%s2776_s16 + $0xb40] sm:$0xff]  ;;  %v742_v37 = vld [vmem:[%s2776_s16 + $0xb10] sm:$0xff]  ;;  %v831_v28 = vld [vmem:[%s2776_s16 + $0xdd8] sm:$0xff]  ;;  %v1963_v30 = vpack.c.bf16 %v814_v24, %v806_v22 }
  0xf5   : > { %1926 = vmatprep.subr.bf16.mxu1 %v1925_v41  ;;  %v765_v41 = vld [vmem:[%s2776_s16 + $0xbc8] sm:$0xff]  ;;  %1035 = vmatprep.mubr.f32.mxu0 %v2990_v42  ;;  %v1819_v45 = vpack.c.bf16 %v748_v36, %v740_v32  ;;  %v1947_v46 = vpack.c.bf16 %v750_v38, %v742_v37  ;;  %v820_v32 = vld [vmem:[%s2776_s16 + $0xd80] sm:$0xff]  ;;  %v1965_v36 = vpack.c.bf16 %v831_v28, %v823_v27  ;;  %v830_v37 = vld [vmem:[%s2776_s16 + $0xdd0] sm:$0xff] }
  0xf6   : > { %1177 = vmatprep.mubr.f32.mxu1 %v2990_v42  ;;  %v837_v38 = vld [vmem:[%s2776_s16 + $0xe08] sm:$0xff]  ;;  %v846_v50 = vld [vmem:[%s2776_s16 + $0xe50] sm:$0xff] }
  0xf7   : > { %1800 = vmatpush1.bf16.msra.mxu0 %v1799_v47  ;;  %v1821_v47 = vpack.c.bf16 %v765_v41, %v757_v40  ;;  %v839_v40 = vld [vmem:[%s2776_s16 + $0xe18] sm:$0xff]  ;;  %v862_v62 = vld [vmem:[%s2776_s16 + $0xed0] sm:$0xff]  ;;  %v893_v12 = vld [vmem:[%s2776_s16 + $0xfc8] sm:$0xff] }
  0xf8   : > { %1928 = vmatpush1.bf16.msra.mxu1 %v1927_v48  ;;  %1802 = vmatprep.subr.bf16.mxu0 %v1801_v49  ;;  %v756_v48 = vld [vmem:[%s2776_s16 + $0xb80] sm:$0xff]  ;;  %v847_v41 = vld [vmem:[%s2776_s16 + $0xe58] sm:$0xff]  ;;  %v878_v10 = vld [vmem:[%s2776_s16 + $0xf50] sm:$0xff] }
  0xf9   : > { %1930 = vmatprep.subr.bf16.mxu1 %v1929_v53  ;;  %v764_v49 = vld [vmem:[%s2776_s16 + $0xbc0] sm:$0xff]  ;;  %v773_v53 = vld [vmem:[%s2776_s16 + $0xc08] sm:$0xff]  ;;  %v894_v22 = vld [vmem:[%s2776_s16 + $0xfd0] sm:$0xff] }
  0xfa   : > { %v1823_v57 = vpack.c.bf16 %v764_v49, %v756_v48  ;;  %v838_v48 = vld [vmem:[%s2776_s16 + $0xe10] sm:$0xff]  ;;  %v1969_v49 = vpack.c.bf16 %v847_v41, %v839_v40  ;;  %v401_v24 = vld [vmem:[%s2776_s16 + $0x68] sm:$0xff] }
  0xfb   : > { %1804 = vmatpush1.bf16.msra.mxu0 %v1803_v59  ;;  %v1825_v59 = vpack.c.bf16 %v781_v54, %v773_v53  ;;  %v855_v53 = vld [vmem:[%s2776_s16 + $0xe98] sm:$0xff]  ;;  %v1971_v56 = vpack.c.bf16 %v846_v50, %v838_v48  ;;  %v3077_v40 = vld [vmem:[%s2893_s18 + $0x10] sm:$0xff] }
  0xfc   : > { %1932 = vmatpush1.bf16.msra.mxu1 %v1931_v60  ;;  %1806 = vmatprep.subr.bf16.mxu0 %v1805_v61  ;;  %v772_v60 = vld [vmem:[%s2776_s16 + $0xc00] sm:$0xff]  ;;  %v863_v54 = vld [vmem:[%s2776_s16 + $0xed8] sm:$0xff]  ;;  %v425_v50 = vld [vmem:[%s2776_s16 + $0x128] sm:$0xff] }
  0xfd   : > { %1934 = vmatprep.subr.bf16.mxu1 %v1933_v1  ;;  %v780_v61 = vld [vmem:[%s2776_s16 + $0xc40] sm:$0xff]  ;;  %v789_v1 = vld [vmem:[%s2776_s16 + $0xc88] sm:$0xff] }
  0xfe   : > { %v1827_v5 = vpack.c.bf16 %v780_v61, %v772_v60  ;;  %v854_v60 = vld [vmem:[%s2776_s16 + $0xe90] sm:$0xff]  ;;  %v1973_v61 = vpack.c.bf16 %v863_v54, %v855_v53  ;;  %v435_v53 = vld [vmem:[%s2776_s16 + $0x178] sm:$0xff] }
  0xff   : > { %1808 = vmatpush1.bf16.msra.mxu0 %v1807_v7  ;;  %v1829_v7 = vpack.c.bf16 %v797_v2, %v789_v1  ;;  %v871_v1 = vld [vmem:[%s2776_s16 + $0xf18] sm:$0xff]  ;;  %v1975_v4 = vpack.c.bf16 %v862_v62, %v854_v60  ;;  %v441_v62 = vld [vmem:[%s2776_s16 + $0x1a8] sm:$0xff] }
 0x100   : > { %1936 = vmatpush1.bf16.msra.mxu1 %v1935_v8  ;;  %1810 = vmatprep.subr.bf16.mxu0 %v1809_v9  ;;  %v788_v8 = vld [vmem:[%s2776_s16 + $0xc80] sm:$0xff]  ;;  %v879_v2 = vld [vmem:[%s2776_s16 + $0xf58] sm:$0xff] }
 0x101   : > { %1938 = vmatprep.subr.bf16.mxu1 %v1937_v13  ;;  %v796_v9 = vld [vmem:[%s2776_s16 + $0xcc0] sm:$0xff]  ;;  %v805_v13 = vld [vmem:[%s2776_s16 + $0xd08] sm:$0xff] }
 0x102   : > { %v1831_v17 = vpack.c.bf16 %v796_v9, %v788_v8  ;;  %v870_v8 = vld [vmem:[%s2776_s16 + $0xf10] sm:$0xff]  ;;  %v1977_v9 = vpack.c.bf16 %v879_v2, %v871_v1  ;;  %v451_v1 = vld [vmem:[%s2776_s16 + $0x1f8] sm:$0xff] }
 0x103   : > { %1812 = vmatpush1.bf16.msra.mxu0 %v1811_v19  ;;  %v1833_v19 = vpack.c.bf16 %v813_v14, %v805_v13  ;;  %v887_v13 = vld [vmem:[%s2776_s16 + $0xf98] sm:$0xff]  ;;  %v1979_v16 = vpack.c.bf16 %v878_v10, %v870_v8  ;;  %v457_v10 = vld [vmem:[%s2776_s16 + $0x228] sm:$0xff] }
 0x104   : > { %1940 = vmatpush1.bf16.msra.mxu1 %v1939_v20  ;;  %1814 = vmatprep.subr.bf16.mxu0 %v1813_v21  ;;  %v804_v20 = vld [vmem:[%s2776_s16 + $0xd00] sm:$0xff]  ;;  %v895_v14 = vld [vmem:[%s2776_s16 + $0xfd8] sm:$0xff] }
 0x105   : > { %1942 = vmatprep.subr.bf16.mxu1 %v1941_v25  ;;  %v812_v21 = vld [vmem:[%s2776_s16 + $0xd40] sm:$0xff]  ;;  %v821_v25 = vld [vmem:[%s2776_s16 + $0xd88] sm:$0xff] }
 0x106   : > { %v1835_v29 = vpack.c.bf16 %v812_v21, %v804_v20  ;;  %v886_v20 = vld [vmem:[%s2776_s16 + $0xf90] sm:$0xff]  ;;  %v1981_v21 = vpack.c.bf16 %v895_v14, %v887_v13 }
 0x107   : > { %1816 = vmatpush1.bf16.msra.mxu0 %v1815_v31  ;;  %v1837_v31 = vpack.c.bf16 %v829_v26, %v821_v25  ;;  %v395_v25 = vld [vmem:[%s2776_s16 + $0x38] sm:$0xff]  ;;  %v1983_v28 = vpack.c.bf16 %v894_v22, %v886_v20  ;;  %v466_v20 = vld [vmem:[%s2776_s16 + $0x270] sm:$0xff]  ;;  %v481_v22 = vld [vmem:[%s2776_s16 + $0x2e8] sm:$0xff] }
 0x108   : > { %1944 = vmatpush1.bf16.msra.mxu1 %v1943_v33  ;;  %1818 = vmatprep.subr.bf16.mxu0 %v1817_v35  ;;  %v828_v33 = vld [vmem:[%s2776_s16 + $0xdc0] sm:$0xff]  ;;  %v822_v35 = vld [vmem:[%s2776_s16 + $0xd90] sm:$0xff]  ;;  %v403_v26 = vld [vmem:[%s2776_s16 + $0x78] sm:$0xff] }
 0x109   : > { %1946 = vmatprep.subr.bf16.mxu1 %v1945_v39  ;;  %v845_v39 = vld [vmem:[%s2776_s16 + $0xe48] sm:$0xff]  ;;  %v1839_v43 = vpack.c.bf16 %v828_v33, %v820_v32  ;;  %v1967_v44 = vpack.c.bf16 %v830_v37, %v822_v35  ;;  %v394_v32 = vld [vmem:[%s2776_s16 + $0x30] sm:$0xff]  ;;  %v2113_v33 = vpack.c.bf16 %v403_v26, %v395_v25 }
 0x10a   : > { %v402_v35 = vld [vmem:[%s2776_s16 + $0x70] sm:$0xff]  ;;  %v417_v37 = vld [vmem:[%s2776_s16 + $0xe8] sm:$0xff] }
 0x10b   : > { %1820 = vmatpush1.bf16.msra.mxu0 %v1819_v45  ;;  %v1841_v45 = vpack.c.bf16 %v845_v39, %v837_v38  ;;  %v411_v38 = vld [vmem:[%s2776_s16 + $0xb8] sm:$0xff] }
 0x10c   : > { %1948 = vmatpush1.bf16.msra.mxu1 %v1947_v46  ;;  %1822 = vmatprep.subr.bf16.mxu0 %v1821_v47  ;;  %v836_v46 = vld [vmem:[%s2776_s16 + $0xe00] sm:$0xff]  ;;  %v419_v39 = vld [vmem:[%s2776_s16 + $0xf8] sm:$0xff] }
 0x10d   : > { %1950 = vmatprep.subr.bf16.mxu1 %v1949_v51  ;;  %v844_v47 = vld [vmem:[%s2776_s16 + $0xe40] sm:$0xff]  ;;  %v853_v51 = vld [vmem:[%s2776_s16 + $0xe88] sm:$0xff]  ;;  %v2117_v48 = vpack.c.bf16 %v419_v39, %v411_v38 }
 0x10e   : > { %v1843_v55 = vpack.c.bf16 %v844_v47, %v836_v46  ;;  %v416_v46 = vld [vmem:[%s2776_s16 + $0xe0] sm:$0xff]  ;;  %v410_v47 = vld [vmem:[%s2776_s16 + $0xb0] sm:$0xff] }
 0x10f   : > { %1824 = vmatpush1.bf16.msra.mxu0 %v1823_v57  ;;  %v1845_v57 = vpack.c.bf16 %v861_v52, %v853_v51  ;;  %v433_v51 = vld [vmem:[%s2776_s16 + $0x168] sm:$0xff]  ;;  %v427_v52 = vld [vmem:[%s2776_s16 + $0x138] sm:$0xff] }
 0x110   : > { %1952 = vmatpush1.bf16.msra.mxu1 %v1951_v58  ;;  %1826 = vmatprep.subr.bf16.mxu0 %v1825_v59  ;;  %v852_v58 = vld [vmem:[%s2776_s16 + $0xe80] sm:$0xff]  ;;  %v2121_v60 = vpack.c.bf16 %v435_v53, %v427_v52 }
 0x111   : > { %1954 = vmatprep.subr.bf16.mxu1 %v1953_v63  ;;  %v860_v59 = vld [vmem:[%s2776_s16 + $0xec0] sm:$0xff]  ;;  %v869_v63 = vld [vmem:[%s2776_s16 + $0xf08] sm:$0xff] }
 0x112   : > { %v1847_v3 = vpack.c.bf16 %v860_v59, %v852_v58  ;;  %v432_v58 = vld [vmem:[%s2776_s16 + $0x160] sm:$0xff]  ;;  %v426_v59 = vld [vmem:[%s2776_s16 + $0x130] sm:$0xff] }
 0x113   : > { %1828 = vmatpush1.bf16.msra.mxu0 %v1827_v5  ;;  %v1849_v5 = vpack.c.bf16 %v877_v0, %v869_v63  ;;  %v449_v63 = vld [vmem:[%s2776_s16 + $0x1e8] sm:$0xff]  ;;  %v443_v0 = vld [vmem:[%s2776_s16 + $0x1b8] sm:$0xff] }
 0x114   : > { %1956 = vmatpush1.bf16.msra.mxu1 %v1955_v6  ;;  %1830 = vmatprep.subr.bf16.mxu0 %v1829_v7  ;;  %v868_v6 = vld [vmem:[%s2776_s16 + $0xf00] sm:$0xff]  ;;  %v2125_v8 = vpack.c.bf16 %v451_v1, %v443_v0 }
 0x115   : > { %1958 = vmatprep.subr.bf16.mxu1 %v1957_v11  ;;  %v876_v7 = vld [vmem:[%s2776_s16 + $0xf40] sm:$0xff]  ;;  %v885_v11 = vld [vmem:[%s2776_s16 + $0xf88] sm:$0xff] }
 0x116   : > { %v1851_v15 = vpack.c.bf16 %v876_v7, %v868_v6  ;;  %v448_v6 = vld [vmem:[%s2776_s16 + $0x1e0] sm:$0xff]  ;;  %v442_v7 = vld [vmem:[%s2776_s16 + $0x1b0] sm:$0xff] }
 0x117   : > { %1832 = vmatpush1.bf16.msra.mxu0 %v1831_v17  ;;  %v1853_v17 = vpack.c.bf16 %v893_v12, %v885_v11  ;;  %v459_v11 = vld [vmem:[%s2776_s16 + $0x238] sm:$0xff] }
 0x118   : > { %1960 = vmatpush1.bf16.msra.mxu1 %v1959_v18  ;;  %1834 = vmatprep.subr.bf16.mxu0 %v1833_v19  ;;  %v884_v18 = vld [vmem:[%s2776_s16 + $0xf80] sm:$0xff]  ;;  %v467_v12 = vld [vmem:[%s2776_s16 + $0x278] sm:$0xff] }
 0x119   : > { %1962 = vmatprep.subr.bf16.mxu1 %v1961_v23  ;;  %v892_v19 = vld [vmem:[%s2776_s16 + $0xfc0] sm:$0xff]  ;;  %v393_v23 = vld [vmem:[%s2776_s16 + $0x28] sm:$0xff] }
 0x11a   : > { %v1855_v27 = vpack.c.bf16 %v892_v19, %v884_v18  ;;  %v458_v18 = vld [vmem:[%s2776_s16 + $0x230] sm:$0xff]  ;;  %v2129_v19 = vpack.c.bf16 %v467_v12, %v459_v11 }
 0x11b   : > { %1836 = vmatpush1.bf16.msra.mxu0 %v1835_v29  ;;  %v1985_v29 = vpack.c.bf16 %v401_v24, %v393_v23  ;;  %v475_v23 = vld [vmem:[%s2776_s16 + $0x2b8] sm:$0xff]  ;;  %v2131_v26 = vpack.c.bf16 %v466_v20, %v458_v18  ;;  %v546_v18 = vld [vmem:[%s2776_s16 + $0x4f0] sm:$0xff]  ;;  %v561_v20 = vld [vmem:[%s2776_s16 + $0x568] sm:$0xff] }
 0x11c   : > { %1964 = vmatpush1.bf16.msra.mxu1 %v1963_v30  ;;  %1838 = vmatprep.subr.bf16.mxu0 %v1837_v31  ;;  %v392_v30 = vld [vmem:[%s2776_s16 + $0x20] sm:$0xff]  ;;  %v483_v24 = vld [vmem:[%s2776_s16 + $0x2f8] sm:$0xff] }
 0x11d   : > { %1966 = vmatprep.subr.bf16.mxu1 %v1965_v36  ;;  %v400_v31 = vld [vmem:[%s2776_s16 + $0x60] sm:$0xff]  ;;  %v409_v36 = vld [vmem:[%s2776_s16 + $0xa8] sm:$0xff] }
 0x11e   : > { %v1987_v41 = vpack.c.bf16 %v400_v31, %v392_v30  ;;  %v474_v30 = vld [vmem:[%s2776_s16 + $0x2b0] sm:$0xff]  ;;  %v2133_v31 = vpack.c.bf16 %v483_v24, %v475_v23 }
 0x11f   : > { %1840 = vmatpush1.bf16.msra.mxu0 %v1839_v43  ;;  %v2115_v43 = vpack.c.bf16 %v402_v35, %v394_v32  ;;  %v482_v32 = vld [vmem:[%s2776_s16 + $0x2f0] sm:$0xff]  ;;  %v497_v35 = vld [vmem:[%s2776_s16 + $0x368] sm:$0xff] }
 0x120   : > { %1968 = vmatpush1.bf16.msra.mxu1 %v1967_v44  ;;  %1842 = vmatprep.subr.bf16.mxu0 %v1841_v45  ;;  %v1989_v44 = vpack.c.bf16 %v417_v37, %v409_v36  ;;  %v408_v45 = vld [vmem:[%s2776_s16 + $0xa0] sm:$0xff]  ;;  %v491_v36 = vld [vmem:[%s2776_s16 + $0x338] sm:$0xff]  ;;  %v2135_v39 = vpack.c.bf16 %v482_v32, %v474_v30  ;;  %v562_v30 = vld [vmem:[%s2776_s16 + $0x570] sm:$0xff] }
 0x121   : > { %1970 = vmatprep.subr.bf16.mxu1 %v1969_v49  ;;  %v418_v49 = vld [vmem:[%s2776_s16 + $0xf0] sm:$0xff]  ;;  %v1991_v54 = vpack.c.bf16 %v416_v46, %v408_v45  ;;  %v499_v37 = vld [vmem:[%s2776_s16 + $0x378] sm:$0xff]  ;;  %v577_v32 = vld [vmem:[%s2776_s16 + $0x5e8] sm:$0xff] }
 0x122   : > { %v490_v45 = vld [vmem:[%s2776_s16 + $0x330] sm:$0xff]  ;;  %v2137_v46 = vpack.c.bf16 %v499_v37, %v491_v36 }
 0x123   : > { %1844 = vmatpush1.bf16.msra.mxu0 %v1843_v55  ;;  %v2119_v55 = vpack.c.bf16 %v418_v49, %v410_v47  ;;  %v498_v47 = vld [vmem:[%s2776_s16 + $0x370] sm:$0xff]  ;;  %v513_v49 = vld [vmem:[%s2776_s16 + $0x3e8] sm:$0xff] }
 0x124   : > { %1972 = vmatpush1.bf16.msra.mxu1 %v1971_v56  ;;  %1846 = vmatprep.subr.bf16.mxu0 %v1845_v57  ;;  %v1993_v56 = vpack.c.bf16 %v433_v51, %v425_v50  ;;  %v424_v57 = vld [vmem:[%s2776_s16 + $0x120] sm:$0xff]  ;;  %v507_v50 = vld [vmem:[%s2776_s16 + $0x3b8] sm:$0xff]  ;;  %v2139_v53 = vpack.c.bf16 %v498_v47, %v490_v45  ;;  %v578_v45 = vld [vmem:[%s2776_s16 + $0x5f0] sm:$0xff] }
 0x125   : > { %1974 = vmatprep.subr.bf16.mxu1 %v1973_v61  ;;  %v434_v61 = vld [vmem:[%s2776_s16 + $0x170] sm:$0xff]  ;;  %v1995_v2 = vpack.c.bf16 %v432_v58, %v424_v57  ;;  %v515_v51 = vld [vmem:[%s2776_s16 + $0x3f8] sm:$0xff]  ;;  %v593_v47 = vld [vmem:[%s2776_s16 + $0x668] sm:$0xff] }
 0x126   : > { %v506_v57 = vld [vmem:[%s2776_s16 + $0x3b0] sm:$0xff]  ;;  %v2141_v58 = vpack.c.bf16 %v515_v51, %v507_v50 }
 0x127   : > { %1848 = vmatpush1.bf16.msra.mxu0 %v1847_v3  ;;  %v2123_v3 = vpack.c.bf16 %v434_v61, %v426_v59  ;;  %v514_v59 = vld [vmem:[%s2776_s16 + $0x3f0] sm:$0xff]  ;;  %v529_v61 = vld [vmem:[%s2776_s16 + $0x468] sm:$0xff] }
 0x128   : > { %1976 = vmatpush1.bf16.msra.mxu1 %v1975_v4  ;;  %1850 = vmatprep.subr.bf16.mxu0 %v1849_v5  ;;  %v1997_v4 = vpack.c.bf16 %v449_v63, %v441_v62  ;;  %v440_v5 = vld [vmem:[%s2776_s16 + $0x1a0] sm:$0xff]  ;;  %v523_v62 = vld [vmem:[%s2776_s16 + $0x438] sm:$0xff]  ;;  %v2143_v1 = vpack.c.bf16 %v514_v59, %v506_v57  ;;  %v594_v57 = vld [vmem:[%s2776_s16 + $0x670] sm:$0xff] }
 0x129   : > { %1978 = vmatprep.subr.bf16.mxu1 %v1977_v9  ;;  %v450_v9 = vld [vmem:[%s2776_s16 + $0x1f0] sm:$0xff]  ;;  %v1999_v13 = vpack.c.bf16 %v448_v6, %v440_v5  ;;  %v531_v63 = vld [vmem:[%s2776_s16 + $0x478] sm:$0xff]  ;;  %v609_v59 = vld [vmem:[%s2776_s16 + $0x6e8] sm:$0xff] }
 0x12a   : > { %v2127_v14 = vpack.c.bf16 %v450_v9, %v442_v7  ;;  %v522_v5 = vld [vmem:[%s2776_s16 + $0x430] sm:$0xff]  ;;  %v2145_v6 = vpack.c.bf16 %v531_v63, %v523_v62  ;;  %v545_v9 = vld [vmem:[%s2776_s16 + $0x4e8] sm:$0xff] }
 0x12b   : > { %1852 = vmatpush1.bf16.msra.mxu0 %v1851_v15  ;;  %v530_v7 = vld [vmem:[%s2776_s16 + $0x470] sm:$0xff] }
 0x12c   : > { %1980 = vmatpush1.bf16.msra.mxu1 %v1979_v16  ;;  %1854 = vmatprep.subr.bf16.mxu0 %v1853_v17  ;;  %v456_v16 = vld [vmem:[%s2776_s16 + $0x220] sm:$0xff]  ;;  %v2147_v12 = vpack.c.bf16 %v530_v7, %v522_v5  ;;  %v610_v5 = vld [vmem:[%s2776_s16 + $0x6f0] sm:$0xff]  ;;  %v625_v7 = vld [vmem:[%s2776_s16 + $0x768] sm:$0xff] }
 0x12d   : > { %1982 = vmatprep.subr.bf16.mxu1 %v1981_v21  ;;  %v464_v17 = vld [vmem:[%s2776_s16 + $0x260] sm:$0xff]  ;;  %v473_v21 = vld [vmem:[%s2776_s16 + $0x2a8] sm:$0xff] }
 0x12e   : > { %v2003_v25 = vpack.c.bf16 %v464_v17, %v456_v16  ;;  %v538_v16 = vld [vmem:[%s2776_s16 + $0x4b0] sm:$0xff] }
 0x12f   : > { %1856 = vmatpush1.bf16.msra.mxu0 %v1855_v27  ;;  %v2005_v27 = vpack.c.bf16 %v481_v22, %v473_v21  ;;  %v555_v21 = vld [vmem:[%s2776_s16 + $0x538] sm:$0xff]  ;;  %v2151_v24 = vpack.c.bf16 %v546_v18, %v538_v16  ;;  %v626_v16 = vld [vmem:[%s2776_s16 + $0x770] sm:$0xff]  ;;  %v641_v18 = vld [vmem:[%s2776_s16 + $0x7e8] sm:$0xff] }
 0x130   : > { %1984 = vmatpush1.bf16.msra.mxu1 %v1983_v28  ;;  %1986 = vmatprep.subr.bf16.mxu0 %v1985_v29  ;;  %v472_v28 = vld [vmem:[%s2776_s16 + $0x2a0] sm:$0xff]  ;;  %v563_v22 = vld [vmem:[%s2776_s16 + $0x578] sm:$0xff] }
 0x131   : > { %2114 = vmatprep.subr.bf16.mxu1 %v2113_v33  ;;  %v480_v29 = vld [vmem:[%s2776_s16 + $0x2e0] sm:$0xff]  ;;  %v489_v33 = vld [vmem:[%s2776_s16 + $0x328] sm:$0xff] }
 0x132   : > { %1036 = vmatmul.mubr.f32.vlgmr.msra.gmra.mrb[0].mxu0 %v3077_v40  ;;  %v2007_v38 = vpack.c.bf16 %v480_v29, %v472_v28  ;;  %v554_v28 = vld [vmem:[%s2776_s16 + $0x530] sm:$0xff]  ;;  %v2153_v29 = vpack.c.bf16 %v563_v22, %v555_v21 }
 0x133   : > { %1178 = vmatmul.mubr.f32.vlgmr.msra.gmra.mrb[0].mxu1 %v3077_v40  ;;  %1988 = vmatpush1.bf16.msra.mxu0 %v1987_v41  ;;  %v2009_v41 = vpack.c.bf16 %v497_v35, %v489_v33  ;;  %v571_v33 = vld [vmem:[%s2776_s16 + $0x5b8] sm:$0xff]  ;;  %v2155_v37 = vpack.c.bf16 %v562_v30, %v554_v28  ;;  %v642_v28 = vld [vmem:[%s2776_s16 + $0x7f0] sm:$0xff]  ;;  %v657_v30 = vld [vmem:[%s2776_s16 + $0x868] sm:$0xff] }
 0x134   : > { %2116 = vmatpush1.bf16.msra.mxu1 %v2115_v43  ;;  %1990 = vmatprep.subr.bf16.mxu0 %v1989_v44  ;;  %v488_v43 = vld [vmem:[%s2776_s16 + $0x320] sm:$0xff]  ;;  %v579_v35 = vld [vmem:[%s2776_s16 + $0x5f8] sm:$0xff] }
 0x135   : > { %2118 = vmatprep.subr.bf16.mxu1 %v2117_v48  ;;  %1248 = vmatprep.mubr.f32.mxu0 %v2896_v34  ;;  %v496_v44 = vld [vmem:[%s2776_s16 + $0x360] sm:$0xff]  ;;  %v505_v48 = vld [vmem:[%s2776_s16 + $0x3a8] sm:$0xff] }
 0x136   : > { %1390 = vmatprep.mubr.f32.mxu1 %v2896_v34  ;;  %v465_v34 = vld [vmem:[%s2776_s16 + $0x268] sm:$0xff]  ;;  %v2011_v52 = vpack.c.bf16 %v496_v44, %v488_v43  ;;  %v570_v43 = vld [vmem:[%s2776_s16 + $0x5b0] sm:$0xff]  ;;  %v2157_v44 = vpack.c.bf16 %v579_v35, %v571_v33 }
 0x137   : > { %1992 = vmatpush1.bf16.msra.mxu0 %v1991_v54  ;;  %v2001_v15 = vpack.c.bf16 %v465_v34, %v457_v10  ;;  %v2013_v54 = vpack.c.bf16 %v513_v49, %v505_v48  ;;  %v539_v10 = vld [vmem:[%s2776_s16 + $0x4b8] sm:$0xff]  ;;  %v2159_v51 = vpack.c.bf16 %v578_v45, %v570_v43  ;;  %v658_v43 = vld [vmem:[%s2776_s16 + $0x870] sm:$0xff]  ;;  %v673_v45 = vld [vmem:[%s2776_s16 + $0x8e8] sm:$0xff] }
 0x138   : > { %2120 = vmatpush1.bf16.msra.mxu1 %v2119_v55  ;;  %1994 = vmatprep.subr.bf16.mxu0 %v1993_v56  ;;  %v504_v55 = vld [vmem:[%s2776_s16 + $0x3a0] sm:$0xff]  ;;  %v547_v34 = vld [vmem:[%s2776_s16 + $0x4f8] sm:$0xff] }
 0x139   : > { %2122 = vmatprep.subr.bf16.mxu1 %v2121_v60  ;;  %v512_v56 = vld [vmem:[%s2776_s16 + $0x3e0] sm:$0xff]  ;;  %v521_v60 = vld [vmem:[%s2776_s16 + $0x428] sm:$0xff]  ;;  %v2149_v17 = vpack.c.bf16 %v547_v34, %v539_v10  ;;  %v587_v48 = vld [vmem:[%s2776_s16 + $0x638] sm:$0xff] }
 0x13a   : > { %v2015_v0 = vpack.c.bf16 %v512_v56, %v504_v55  ;;  %v595_v49 = vld [vmem:[%s2776_s16 + $0x678] sm:$0xff]  ;;  %v586_v55 = vld [vmem:[%s2776_s16 + $0x630] sm:$0xff] }
 0x13b   : > { %1996 = vmatpush1.bf16.msra.mxu0 %v1995_v2  ;;  %v2017_v2 = vpack.c.bf16 %v529_v61, %v521_v60  ;;  %v2161_v56 = vpack.c.bf16 %v595_v49, %v587_v48  ;;  %v603_v60 = vld [vmem:[%s2776_s16 + $0x6b8] sm:$0xff]  ;;  %v2163_v63 = vpack.c.bf16 %v594_v57, %v586_v55  ;;  %v674_v55 = vld [vmem:[%s2776_s16 + $0x8f0] sm:$0xff]  ;;  %v689_v57 = vld [vmem:[%s2776_s16 + $0x968] sm:$0xff] }
 0x13c   : > { %2124 = vmatpush1.bf16.msra.mxu1 %v2123_v3  ;;  %1998 = vmatprep.subr.bf16.mxu0 %v1997_v4  ;;  %v520_v3 = vld [vmem:[%s2776_s16 + $0x420] sm:$0xff]  ;;  %v611_v61 = vld [vmem:[%s2776_s16 + $0x6f8] sm:$0xff] }
 0x13d   : > { %2126 = vmatprep.subr.bf16.mxu1 %v2125_v8  ;;  %v528_v4 = vld [vmem:[%s2776_s16 + $0x460] sm:$0xff]  ;;  %v537_v8 = vld [vmem:[%s2776_s16 + $0x4a8] sm:$0xff] }
 0x13e   : > { %v2019_v11 = vpack.c.bf16 %v528_v4, %v520_v3  ;;  %v602_v3 = vld [vmem:[%s2776_s16 + $0x6b0] sm:$0xff]  ;;  %v2165_v4 = vpack.c.bf16 %v611_v61, %v603_v60  ;;  %v691_v60 = vld [vmem:[%s2776_s16 + $0x978] sm:$0xff] }
 0x13f   : > { %2000 = vmatpush1.bf16.msra.mxu0 %v1999_v13  ;;  %v2021_v13 = vpack.c.bf16 %v545_v9, %v537_v8  ;;  %v619_v8 = vld [vmem:[%s2776_s16 + $0x738] sm:$0xff]  ;;  %v2167_v34 = vpack.c.bf16 %v610_v5, %v602_v3  ;;  %v697_v5 = vld [vmem:[%s2776_s16 + $0x9a8] sm:$0xff] }
 0x140   : > { %2128 = vmatpush1.bf16.msra.mxu1 %v2127_v14  ;;  %2002 = vmatprep.subr.bf16.mxu0 %v2001_v15  ;;  %v536_v14 = vld [vmem:[%s2776_s16 + $0x4a0] sm:$0xff]  ;;  %v627_v9 = vld [vmem:[%s2776_s16 + $0x778] sm:$0xff] }
 0x141   : > { %2130 = vmatprep.subr.bf16.mxu1 %v2129_v19  ;;  %v544_v15 = vld [vmem:[%s2776_s16 + $0x4e0] sm:$0xff]  ;;  %v553_v19 = vld [vmem:[%s2776_s16 + $0x528] sm:$0xff] }
 0x142   : > { %v2023_v23 = vpack.c.bf16 %v544_v15, %v536_v14  ;;  %v618_v14 = vld [vmem:[%s2776_s16 + $0x730] sm:$0xff]  ;;  %v2169_v15 = vpack.c.bf16 %v627_v9, %v619_v8  ;;  %v707_v8 = vld [vmem:[%s2776_s16 + $0x9f8] sm:$0xff] }
 0x143   : > { %2004 = vmatpush1.bf16.msra.mxu0 %v2003_v25  ;;  %v2025_v25 = vpack.c.bf16 %v561_v20, %v553_v19  ;;  %v635_v19 = vld [vmem:[%s2776_s16 + $0x7b8] sm:$0xff]  ;;  %v2171_v22 = vpack.c.bf16 %v626_v16, %v618_v14  ;;  %v713_v16 = vld [vmem:[%s2776_s16 + $0xa28] sm:$0xff] }
 0x144   : > { %2132 = vmatpush1.bf16.msra.mxu1 %v2131_v26  ;;  %2006 = vmatprep.subr.bf16.mxu0 %v2005_v27  ;;  %v552_v26 = vld [vmem:[%s2776_s16 + $0x520] sm:$0xff]  ;;  %v643_v20 = vld [vmem:[%s2776_s16 + $0x7f8] sm:$0xff] }
 0x145   : > { %2134 = vmatprep.subr.bf16.mxu1 %v2133_v31  ;;  %v560_v27 = vld [vmem:[%s2776_s16 + $0x560] sm:$0xff]  ;;  %v569_v31 = vld [vmem:[%s2776_s16 + $0x5a8] sm:$0xff] }
 0x146   : > { %v2027_v36 = vpack.c.bf16 %v560_v27, %v552_v26  ;;  %v634_v26 = vld [vmem:[%s2776_s16 + $0x7b0] sm:$0xff]  ;;  %v2173_v27 = vpack.c.bf16 %v643_v20, %v635_v19 }
 0x147   : > { %2008 = vmatpush1.bf16.msra.mxu0 %v2007_v38  ;;  %v2029_v38 = vpack.c.bf16 %v577_v32, %v569_v31  ;;  %v651_v31 = vld [vmem:[%s2776_s16 + $0x838] sm:$0xff]  ;;  %v2175_v35 = vpack.c.bf16 %v642_v28, %v634_v26  ;;  %v722_v26 = vld [vmem:[%s2776_s16 + $0xa70] sm:$0xff]  ;;  %v737_v28 = vld [vmem:[%s2776_s16 + $0xae8] sm:$0xff] }
 0x148   : > { %2136 = vmatpush1.bf16.msra.mxu1 %v2135_v39  ;;  %2010 = vmatprep.subr.bf16.mxu0 %v2009_v41  ;;  %v568_v39 = vld [vmem:[%s2776_s16 + $0x5a0] sm:$0xff]  ;;  %v659_v32 = vld [vmem:[%s2776_s16 + $0x878] sm:$0xff] }
 0x149   : > { %2138 = vmatprep.subr.bf16.mxu1 %v2137_v46  ;;  %v576_v41 = vld [vmem:[%s2776_s16 + $0x5e0] sm:$0xff]  ;;  %v585_v46 = vld [vmem:[%s2776_s16 + $0x628] sm:$0xff] }
 0x14a   : > { %v2031_v50 = vpack.c.bf16 %v576_v41, %v568_v39  ;;  %v650_v39 = vld [vmem:[%s2776_s16 + $0x830] sm:$0xff]  ;;  %v2177_v41 = vpack.c.bf16 %v659_v32, %v651_v31 }
 0x14b   : > { %2012 = vmatpush1.bf16.msra.mxu0 %v2011_v52  ;;  %v2033_v52 = vpack.c.bf16 %v593_v47, %v585_v46  ;;  %v667_v46 = vld [vmem:[%s2776_s16 + $0x8b8] sm:$0xff]  ;;  %v2179_v49 = vpack.c.bf16 %v658_v43, %v650_v39  ;;  %v738_v39 = vld [vmem:[%s2776_s16 + $0xaf0] sm:$0xff]  ;;  %v753_v43 = vld [vmem:[%s2776_s16 + $0xb68] sm:$0xff] }
 0x14c   : > { %2140 = vmatpush1.bf16.msra.mxu1 %v2139_v53  ;;  %2014 = vmatprep.subr.bf16.mxu0 %v2013_v54  ;;  %v584_v53 = vld [vmem:[%s2776_s16 + $0x620] sm:$0xff]  ;;  %v675_v47 = vld [vmem:[%s2776_s16 + $0x8f8] sm:$0xff] }
 0x14d   : > { %2142 = vmatprep.subr.bf16.mxu1 %v2141_v58  ;;  %v592_v54 = vld [vmem:[%s2776_s16 + $0x660] sm:$0xff]  ;;  %v601_v58 = vld [vmem:[%s2776_s16 + $0x6a8] sm:$0xff] }
 0x14e   : > { %v2035_v62 = vpack.c.bf16 %v592_v54, %v584_v53  ;;  %v666_v53 = vld [vmem:[%s2776_s16 + $0x8b0] sm:$0xff]  ;;  %v2181_v54 = vpack.c.bf16 %v675_v47, %v667_v46 }
 0x14f   : > { %2016 = vmatpush1.bf16.msra.mxu0 %v2015_v0  ;;  %v2037_v0 = vpack.c.bf16 %v609_v59, %v601_v58  ;;  %v2332_v58 = vld [vmem:[%s2893_s18] sm:$0xff] }
 0x150   : > { %2144 = vmatpush1.bf16.msra.mxu1 %v2143_v1  ;;  %2018 = vmatprep.subr.bf16.mxu0 %v2017_v2  ;;  %v600_v1 = vld [vmem:[%s2776_s16 + $0x6a0] sm:$0xff]  ;;  %v683_v59 = vld [vmem:[%s2776_s16 + $0x938] sm:$0xff] }
 0x151   : > { %2146 = vmatprep.subr.bf16.mxu1 %v2145_v6  ;;  %v608_v2 = vld [vmem:[%s2776_s16 + $0x6e0] sm:$0xff]  ;;  %v617_v6 = vld [vmem:[%s2776_s16 + $0x728] sm:$0xff]  ;;  %v2185_v3 = vpack.c.bf16 %v691_v60, %v683_v59 }
 0x152   : > { %v2039_v10 = vpack.c.bf16 %v608_v2, %v600_v1  ;;  %v688_v1 = vld [vmem:[%s2776_s16 + $0x960] sm:$0xff]  ;;  %v682_v2 = vld [vmem:[%s2776_s16 + $0x930] sm:$0xff] }
 0x153   : > { %2020 = vmatpush1.bf16.msra.mxu0 %v2019_v11  ;;  %v2041_v11 = vpack.c.bf16 %v625_v7, %v617_v6  ;;  %v705_v6 = vld [vmem:[%s2776_s16 + $0x9e8] sm:$0xff]  ;;  %v699_v7 = vld [vmem:[%s2776_s16 + $0x9b8] sm:$0xff] }
 0x154   : > { %2148 = vmatpush1.bf16.msra.mxu1 %v2147_v12  ;;  %2022 = vmatprep.subr.bf16.mxu0 %v2021_v13  ;;  %v616_v12 = vld [vmem:[%s2776_s16 + $0x720] sm:$0xff]  ;;  %v2189_v14 = vpack.c.bf16 %v707_v8, %v699_v7 }
 0x155   : > { %2150 = vmatprep.subr.bf16.mxu1 %v2149_v17  ;;  %v624_v13 = vld [vmem:[%s2776_s16 + $0x760] sm:$0xff]  ;;  %v633_v17 = vld [vmem:[%s2776_s16 + $0x7a8] sm:$0xff] }
 0x156   : > { %v2043_v21 = vpack.c.bf16 %v624_v13, %v616_v12  ;;  %v704_v12 = vld [vmem:[%s2776_s16 + $0x9e0] sm:$0xff]  ;;  %v698_v13 = vld [vmem:[%s2776_s16 + $0x9b0] sm:$0xff] }
 0x157   : > { %2024 = vmatpush1.bf16.msra.mxu0 %v2023_v23  ;;  %v2045_v23 = vpack.c.bf16 %v641_v18, %v633_v17  ;;  %v715_v17 = vld [vmem:[%s2776_s16 + $0xa38] sm:$0xff] }
 0x158   : > { %2152 = vmatpush1.bf16.msra.mxu1 %v2151_v24  ;;  %2026 = vmatprep.subr.bf16.mxu0 %v2025_v25  ;;  %v632_v24 = vld [vmem:[%s2776_s16 + $0x7a0] sm:$0xff]  ;;  %v723_v18 = vld [vmem:[%s2776_s16 + $0xa78] sm:$0xff] }
 0x159   : > { %2154 = vmatprep.subr.bf16.mxu1 %v2153_v29  ;;  %v640_v25 = vld [vmem:[%s2776_s16 + $0x7e0] sm:$0xff]  ;;  %v649_v29 = vld [vmem:[%s2776_s16 + $0x828] sm:$0xff] }
 0x15a   : > { %v2047_v33 = vpack.c.bf16 %v640_v25, %v632_v24  ;;  %v714_v24 = vld [vmem:[%s2776_s16 + $0xa30] sm:$0xff]  ;;  %v2193_v25 = vpack.c.bf16 %v723_v18, %v715_v17 }
 0x15b   : > { %2028 = vmatpush1.bf16.msra.mxu0 %v2027_v36  ;;  %v2049_v36 = vpack.c.bf16 %v657_v30, %v649_v29  ;;  %v731_v29 = vld [vmem:[%s2776_s16 + $0xab8] sm:$0xff]  ;;  %v2195_v32 = vpack.c.bf16 %v722_v26, %v714_v24  ;;  %v809_v24 = vld [vmem:[%s2776_s16 + $0xd28] sm:$0xff] }
 0x15c   : > { %2156 = vmatpush1.bf16.msra.mxu1 %v2155_v37  ;;  %2030 = vmatprep.subr.bf16.mxu0 %v2029_v38  ;;  %v648_v37 = vld [vmem:[%s2776_s16 + $0x820] sm:$0xff]  ;;  %v739_v30 = vld [vmem:[%s2776_s16 + $0xaf8] sm:$0xff] }
 0x15d   : > { %2158 = vmatprep.subr.bf16.mxu1 %v2157_v44  ;;  %v656_v38 = vld [vmem:[%s2776_s16 + $0x860] sm:$0xff]  ;;  %v665_v44 = vld [vmem:[%s2776_s16 + $0x8a8] sm:$0xff]  ;;  %v811_v26 = vld [vmem:[%s2776_s16 + $0xd38] sm:$0xff] }
 0x15e   : > { %v2051_v48 = vpack.c.bf16 %v656_v38, %v648_v37  ;;  %v730_v37 = vld [vmem:[%s2776_s16 + $0xab0] sm:$0xff]  ;;  %v2197_v38 = vpack.c.bf16 %v739_v30, %v731_v29 }
 0x15f   : > { %2032 = vmatpush1.bf16.msra.mxu0 %v2031_v50  ;;  %v2053_v50 = vpack.c.bf16 %v673_v45, %v665_v44  ;;  %v747_v44 = vld [vmem:[%s2776_s16 + $0xb38] sm:$0xff]  ;;  %v2199_v47 = vpack.c.bf16 %v738_v39, %v730_v37  ;;  %v825_v37 = vld [vmem:[%s2776_s16 + $0xda8] sm:$0xff] }
 0x160   : > { %2160 = vmatpush1.bf16.msra.mxu1 %v2159_v51  ;;  %2034 = vmatprep.subr.bf16.mxu0 %v2033_v52  ;;  %v664_v51 = vld [vmem:[%s2776_s16 + $0x8a0] sm:$0xff]  ;;  %v755_v45 = vld [vmem:[%s2776_s16 + $0xb78] sm:$0xff] }
 0x161   : > { %2162 = vmatprep.subr.bf16.mxu1 %v2161_v56  ;;  %v672_v52 = vld [vmem:[%s2776_s16 + $0x8e0] sm:$0xff]  ;;  %v681_v56 = vld [vmem:[%s2776_s16 + $0x928] sm:$0xff]  ;;  %v827_v39 = vld [vmem:[%s2776_s16 + $0xdb8] sm:$0xff] }
 0x162   : > { %v2055_v61 = vpack.c.bf16 %v672_v52, %v664_v51  ;;  %v746_v51 = vld [vmem:[%s2776_s16 + $0xb30] sm:$0xff]  ;;  %v2201_v52 = vpack.c.bf16 %v755_v45, %v747_v44 }
 0x163   : > { %2036 = vmatpush1.bf16.msra.mxu0 %v2035_v62  ;;  %v2183_v62 = vpack.c.bf16 %v674_v55, %v666_v53  ;;  %v754_v53 = vld [vmem:[%s2776_s16 + $0xb70] sm:$0xff]  ;;  %v769_v55 = vld [vmem:[%s2776_s16 + $0xbe8] sm:$0xff] }
 0x164   : > { %2164 = vmatpush1.bf16.msra.mxu1 %v2163_v63  ;;  %2038 = vmatprep.subr.bf16.mxu0 %v2037_v0  ;;  %v2057_v63 = vpack.c.bf16 %v689_v57, %v681_v56  ;;  %v680_v0 = vld [vmem:[%s2776_s16 + $0x920] sm:$0xff]  ;;  %v763_v56 = vld [vmem:[%s2776_s16 + $0xbb8] sm:$0xff]  ;;  %v2203_v59 = vpack.c.bf16 %v754_v53, %v746_v51  ;;  %v841_v51 = vld [vmem:[%s2776_s16 + $0xe28] sm:$0xff] }
 0x165   : > { %2166 = vmatprep.subr.bf16.mxu1 %v2165_v4  ;;  %v690_v4 = vld [vmem:[%s2776_s16 + $0x970] sm:$0xff]  ;;  %v2059_v9 = vpack.c.bf16 %v688_v1, %v680_v0  ;;  %v771_v57 = vld [vmem:[%s2776_s16 + $0xbf8] sm:$0xff] }
 0x166   : > { %v2205_v0 = vpack.c.bf16 %v771_v57, %v763_v56  ;;  %v770_v1 = vld [vmem:[%s2776_s16 + $0xbf0] sm:$0xff]  ;;  %v843_v53 = vld [vmem:[%s2776_s16 + $0xe38] sm:$0xff] }
 0x167   : > { %2040 = vmatpush1.bf16.msra.mxu0 %v2039_v10  ;;  %v2187_v10 = vpack.c.bf16 %v690_v4, %v682_v2  ;;  %v777_v2 = vld [vmem:[%s2776_s16 + $0xc28] sm:$0xff]  ;;  %v779_v4 = vld [vmem:[%s2776_s16 + $0xc38] sm:$0xff] }
 0x168   : > { %2168 = vmatpush1.bf16.msra.mxu1 %v2167_v34  ;;  %2042 = vmatprep.subr.bf16.mxu0 %v2041_v11  ;;  %v2061_v34 = vpack.c.bf16 %v705_v6, %v697_v5  ;;  %v696_v11 = vld [vmem:[%s2776_s16 + $0x9a0] sm:$0xff]  ;;  %v787_v5 = vld [vmem:[%s2776_s16 + $0xc78] sm:$0xff] }
 0x169   : > { %2170 = vmatprep.subr.bf16.mxu1 %v2169_v15  ;;  %v706_v15 = vld [vmem:[%s2776_s16 + $0x9f0] sm:$0xff]  ;;  %v2063_v19 = vpack.c.bf16 %v704_v12, %v696_v11  ;;  %v2209_v11 = vpack.c.bf16 %v787_v5, %v779_v4 }
 0x16a   : > { %v2191_v20 = vpack.c.bf16 %v706_v15, %v698_v13  ;;  %v786_v12 = vld [vmem:[%s2776_s16 + $0xc70] sm:$0xff]  ;;  %v793_v13 = vld [vmem:[%s2776_s16 + $0xca8] sm:$0xff]  ;;  %v795_v15 = vld [vmem:[%s2776_s16 + $0xcb8] sm:$0xff] }
 0x16b   : > { %2044 = vmatpush1.bf16.msra.mxu0 %v2043_v21 }
 0x16c   : > { %2172 = vmatpush1.bf16.msra.mxu1 %v2171_v22  ;;  %2046 = vmatprep.subr.bf16.mxu0 %v2045_v23  ;;  %v712_v22 = vld [vmem:[%s2776_s16 + $0xa20] sm:$0xff] }
 0x16d   : > { %2174 = vmatprep.subr.bf16.mxu1 %v2173_v27  ;;  %v720_v23 = vld [vmem:[%s2776_s16 + $0xa60] sm:$0xff]  ;;  %v729_v27 = vld [vmem:[%s2776_s16 + $0xaa8] sm:$0xff] }
 0x16e   : > { %v2067_v31 = vpack.c.bf16 %v720_v23, %v712_v22  ;;  %v802_v23 = vld [vmem:[%s2776_s16 + $0xcf0] sm:$0xff] }
 0x16f   : > { %2048 = vmatpush1.bf16.msra.mxu0 %v2047_v33  ;;  %v2069_v33 = vpack.c.bf16 %v737_v28, %v729_v27  ;;  %v819_v27 = vld [vmem:[%s2776_s16 + $0xd78] sm:$0xff] }
 0x170   : > { %2176 = vmatpush1.bf16.msra.mxu1 %v2175_v35  ;;  %2050 = vmatprep.subr.bf16.mxu0 %v2049_v36  ;;  %v728_v35 = vld [vmem:[%s2776_s16 + $0xaa0] sm:$0xff] }
 0x171   : > { %2178 = vmatprep.subr.bf16.mxu1 %v2177_v41  ;;  %v736_v36 = vld [vmem:[%s2776_s16 + $0xae0] sm:$0xff]  ;;  %v745_v41 = vld [vmem:[%s2776_s16 + $0xb28] sm:$0xff] }
 0x172   : > { %1249 = vmatmul.mubr.f32.vlgmr.msra.gmra.mrb[2].mxu0 %v2332_v58  ;;  %v2071_v46 = vpack.c.bf16 %v736_v36, %v728_v35  ;;  %v2217_v35 = vpack.c.bf16 %v819_v27, %v811_v26  ;;  %v818_v36 = vld [vmem:[%s2776_s16 + $0xd70] sm:$0xff] }
 0x173   : > { %2052 = vmatpush1.bf16.msra.mxu0 %v2051_v48  ;;  %1391 = vmatmul.mubr.f32.vlgmr.msra.gmra.mrb[2].mxu1 %v2332_v58  ;;  %v2073_v48 = vpack.c.bf16 %v753_v43, %v745_v41  ;;  %v835_v41 = vld [vmem:[%s2776_s16 + $0xdf8] sm:$0xff] }
 0x174   : > { %2180 = vmatpush1.bf16.msra.mxu1 %v2179_v49  ;;  %2054 = vmatprep.subr.bf16.mxu0 %v2053_v50  ;;  %v744_v49 = vld [vmem:[%s2776_s16 + $0xb20] sm:$0xff] }
 0x175   : > { %2182 = vmatprep.subr.bf16.mxu1 %v2181_v54  ;;  %1319 = vmatprep.mubr.f32.mxu0 %v2990_v42  ;;  %v752_v50 = vld [vmem:[%s2776_s16 + $0xb60] sm:$0xff]  ;;  %v761_v54 = vld [vmem:[%s2776_s16 + $0xba8] sm:$0xff] }
 0x176   : > { %1461 = vmatprep.mubr.f32.mxu1 %v2990_v42  ;;  %v721_v42 = vld [vmem:[%s2776_s16 + $0xa68] sm:$0xff]  ;;  %v2075_v58 = vpack.c.bf16 %v752_v50, %v744_v49  ;;  %v2077_v60 = vpack.c.bf16 %v769_v55, %v761_v54  ;;  %v2221_v49 = vpack.c.bf16 %v835_v41, %v827_v39  ;;  %v834_v50 = vld [vmem:[%s2776_s16 + $0xdf0] sm:$0xff]  ;;  %v851_v54 = vld [vmem:[%s2776_s16 + $0xe78] sm:$0xff] }
 0x177   : > { %2056 = vmatpush1.bf16.msra.mxu0 %v2055_v61  ;;  %v2065_v21 = vpack.c.bf16 %v721_v42, %v713_v16  ;;  %v760_v61 = vld [vmem:[%s2776_s16 + $0xba0] sm:$0xff]  ;;  %v803_v16 = vld [vmem:[%s2776_s16 + $0xcf8] sm:$0xff] }
 0x178   : > { %2184 = vmatpush1.bf16.msra.mxu1 %v2183_v62  ;;  %2058 = vmatprep.subr.bf16.mxu0 %v2057_v63  ;;  %v768_v62 = vld [vmem:[%s2776_s16 + $0xbe0] sm:$0xff]  ;;  %v762_v63 = vld [vmem:[%s2776_s16 + $0xbb0] sm:$0xff]  ;;  %v2213_v22 = vpack.c.bf16 %v803_v16, %v795_v15 }
 0x179   : > { %2186 = vmatprep.subr.bf16.mxu1 %v2185_v3  ;;  %v785_v3 = vld [vmem:[%s2776_s16 + $0xc68] sm:$0xff]  ;;  %v2079_v6 = vpack.c.bf16 %v768_v62, %v760_v61  ;;  %v2207_v7 = vpack.c.bf16 %v770_v1, %v762_v63  ;;  %v2225_v61 = vpack.c.bf16 %v851_v54, %v843_v53  ;;  %v850_v62 = vld [vmem:[%s2776_s16 + $0xe70] sm:$0xff]  ;;  %v859_v1 = vld [vmem:[%s2776_s16 + $0xeb8] sm:$0xff] }
 0x17a   : > { %v2081_v8 = vpack.c.bf16 %v785_v3, %v777_v2  ;;  %v857_v63 = vld [vmem:[%s2776_s16 + $0xea8] sm:$0xff]  ;;  %v867_v2 = vld [vmem:[%s2776_s16 + $0xef8] sm:$0xff] }
 0x17b   : > { %2060 = vmatpush1.bf16.msra.mxu0 %v2059_v9  ;;  %v776_v9 = vld [vmem:[%s2776_s16 + $0xc20] sm:$0xff]  ;;  %v376_v41 = vld [vmem:[#allocation3 + $0x18] sm:$0xff] }
 0x17c   : > { %2188 = vmatpush1.bf16.msra.mxu1 %v2187_v10  ;;  %2062 = vmatprep.subr.bf16.mxu0 %v2061_v34  ;;  %v784_v10 = vld [vmem:[%s2776_s16 + $0xc60] sm:$0xff]  ;;  %v778_v34 = vld [vmem:[%s2776_s16 + $0xc30] sm:$0xff] }
 0x17d   : > { %2190 = vmatprep.subr.bf16.mxu1 %v2189_v14  ;;  %v801_v14 = vld [vmem:[%s2776_s16 + $0xce8] sm:$0xff]  ;;  %v2083_v42 = vpack.c.bf16 %v784_v10, %v776_v9  ;;  %v2211_v17 = vpack.c.bf16 %v786_v12, %v778_v34  ;;  %v2229_v9 = vpack.c.bf16 %v867_v2, %v859_v1  ;;  %v866_v10 = vld [vmem:[%s2776_s16 + $0xef0] sm:$0xff]  ;;  %v875_v12 = vld [vmem:[%s2776_s16 + $0xf38] sm:$0xff] }
 0x17e   : > { %v2085_v18 = vpack.c.bf16 %v801_v14, %v793_v13  ;;  %v873_v34 = vld [vmem:[%s2776_s16 + $0xf28] sm:$0xff]  ;;  %v883_v13 = vld [vmem:[%s2776_s16 + $0xf78] sm:$0xff] }
 0x17f   : > { %2064 = vmatpush1.bf16.msra.mxu0 %v2063_v19  ;;  %v792_v19 = vld [vmem:[%s2776_s16 + $0xca0] sm:$0xff]  ;;  %v380_v53 = vld [vmem:[#allocation3 + $0x38] sm:$0xff] }
 0x180   : > { %2192 = vmatpush1.bf16.msra.mxu1 %v2191_v20  ;;  %2066 = vmatprep.subr.bf16.mxu0 %v2065_v21  ;;  %v800_v20 = vld [vmem:[%s2776_s16 + $0xce0] sm:$0xff]  ;;  %v794_v21 = vld [vmem:[%s2776_s16 + $0xcb0] sm:$0xff] }
 0x181   : > { %2194 = vmatprep.subr.bf16.mxu1 %v2193_v25  ;;  %v817_v25 = vld [vmem:[%s2776_s16 + $0xd68] sm:$0xff]  ;;  %v2087_v28 = vpack.c.bf16 %v800_v20, %v792_v19  ;;  %v2215_v29 = vpack.c.bf16 %v802_v23, %v794_v21  ;;  %v2233_v19 = vpack.c.bf16 %v883_v13, %v875_v12  ;;  %v882_v20 = vld [vmem:[%s2776_s16 + $0xf70] sm:$0xff]  ;;  %v891_v23 = vld [vmem:[%s2776_s16 + $0xfb8] sm:$0xff] }
 0x182   : > { %v2089_v30 = vpack.c.bf16 %v817_v25, %v809_v24  ;;  %v889_v21 = vld [vmem:[%s2776_s16 + $0xfa8] sm:$0xff]  ;;  %v899_v24 = vld [vmem:[%s2776_s16 + $0xff8] sm:$0xff] }
 0x183   : > { %2068 = vmatpush1.bf16.msra.mxu0 %v2067_v31  ;;  %v808_v31 = vld [vmem:[%s2776_s16 + $0xd20] sm:$0xff] }
 0x184   : > { %2196 = vmatpush1.bf16.msra.mxu1 %v2195_v32  ;;  %2070 = vmatprep.subr.bf16.mxu0 %v2069_v33  ;;  %v816_v32 = vld [vmem:[%s2776_s16 + $0xd60] sm:$0xff]  ;;  %v810_v33 = vld [vmem:[%s2776_s16 + $0xd30] sm:$0xff] }
 0x185   : > { %2198 = vmatprep.subr.bf16.mxu1 %v2197_v38  ;;  %v833_v38 = vld [vmem:[%s2776_s16 + $0xde8] sm:$0xff]  ;;  %v2091_v43 = vpack.c.bf16 %v816_v32, %v808_v31  ;;  %v2219_v44 = vpack.c.bf16 %v818_v36, %v810_v33  ;;  %v890_v31 = vld [vmem:[%s2776_s16 + $0xfb0] sm:$0xff]  ;;  %v373_v36 = vld [vmem:[#allocation3] sm:$0xff] }
 0x186   : > { %v2093_v45 = vpack.c.bf16 %v833_v38, %v825_v37  ;;  %v898_v32 = vld [vmem:[%s2776_s16 + $0xff0] sm:$0xff]  ;;  %v374_v38 = vld [vmem:[#allocation3 + $0x8] sm:$0xff] }
 0x187   : > { %2072 = vmatpush1.bf16.msra.mxu0 %v2071_v46  ;;  %v824_v46 = vld [vmem:[%s2776_s16 + $0xda0] sm:$0xff]  ;;  %v375_v37 = vld [vmem:[#allocation3 + $0x10] sm:$0xff] }
 0x188   : > { %2200 = vmatpush1.bf16.msra.mxu1 %v2199_v47  ;;  %2074 = vmatprep.subr.bf16.mxu0 %v2073_v48  ;;  %v832_v47 = vld [vmem:[%s2776_s16 + $0xde0] sm:$0xff]  ;;  %v826_v48 = vld [vmem:[%s2776_s16 + $0xdb0] sm:$0xff] }
 0x189   : > { %2202 = vmatprep.subr.bf16.mxu1 %v2201_v52  ;;  %v849_v52 = vld [vmem:[%s2776_s16 + $0xe68] sm:$0xff]  ;;  %v2095_v55 = vpack.c.bf16 %v832_v47, %v824_v46  ;;  %v2223_v56 = vpack.c.bf16 %v834_v50, %v826_v48  ;;  %v377_v50 = vld [vmem:[#allocation3 + $0x20] sm:$0xff] }
 0x18a   : > { %v2097_v57 = vpack.c.bf16 %v849_v52, %v841_v51  ;;  %v379_v51 = vld [vmem:[#allocation3 + $0x30] sm:$0xff]  ;;  %v378_v52 = vld [vmem:[#allocation3 + $0x28] sm:$0xff] }
 0x18b   : > { %2076 = vmatpush1.bf16.msra.mxu0 %v2075_v58  ;;  %v840_v58 = vld [vmem:[%s2776_s16 + $0xe20] sm:$0xff] }
 0x18c   : > { %2204 = vmatpush1.bf16.msra.mxu1 %v2203_v59  ;;  %2078 = vmatprep.subr.bf16.mxu0 %v2077_v60  ;;  %v848_v59 = vld [vmem:[%s2776_s16 + $0xe60] sm:$0xff]  ;;  %v842_v60 = vld [vmem:[%s2776_s16 + $0xe30] sm:$0xff] }
 0x18d   : > { %2206 = vmatprep.subr.bf16.mxu1 %v2205_v0  ;;  %v865_v0 = vld [vmem:[%s2776_s16 + $0xee8] sm:$0xff]  ;;  %v2099_v3 = vpack.c.bf16 %v848_v59, %v840_v58  ;;  %v2227_v4 = vpack.c.bf16 %v850_v62, %v842_v60 }
 0x18e   : > { %v2101_v5 = vpack.c.bf16 %v865_v0, %v857_v63  ;;  %v1496_v63 = vld [vmem:[#allocation10] sm:$0xff] (!%p1722_p12) }
 0x18f   : > { %2080 = vmatpush1.bf16.msra.mxu0 %v2079_v6  ;;  %v856_v6 = vld [vmem:[%s2776_s16 + $0xea0] sm:$0xff] }
 0x190   : > { %2208 = vmatpush1.bf16.msra.mxu1 %v2207_v7  ;;  %2082 = vmatprep.subr.bf16.mxu0 %v2081_v8  ;;  %v864_v7 = vld [vmem:[%s2776_s16 + $0xee0] sm:$0xff]  ;;  %v858_v8 = vld [vmem:[%s2776_s16 + $0xeb0] sm:$0xff] }
 0x191   : > { %2210 = vmatprep.subr.bf16.mxu1 %v2209_v11  ;;  %v881_v11 = vld [vmem:[%s2776_s16 + $0xf68] sm:$0xff]  ;;  %v2103_v14 = vpack.c.bf16 %v864_v7, %v856_v6  ;;  %v2231_v15 = vpack.c.bf16 %v866_v10, %v858_v8 }
 0x192   : > { %v2105_v16 = vpack.c.bf16 %v881_v11, %v873_v34 }
 0x193   : > { %2084 = vmatpush1.bf16.msra.mxu0 %v2083_v42  ;;  %v872_v42 = vld [vmem:[%s2776_s16 + $0xf20] sm:$0xff] }
 0x194   : > { %2212 = vmatpush1.bf16.msra.mxu1 %v2211_v17  ;;  %2086 = vmatprep.subr.bf16.mxu0 %v2085_v18  ;;  %v880_v17 = vld [vmem:[%s2776_s16 + $0xf60] sm:$0xff]  ;;  %v874_v18 = vld [vmem:[%s2776_s16 + $0xf30] sm:$0xff] }
 0x195   : > { %2214 = vmatprep.subr.bf16.mxu1 %v2213_v22  ;;  %v897_v22 = vld [vmem:[%s2776_s16 + $0xfe8] sm:$0xff]  ;;  %v2107_v25 = vpack.c.bf16 %v880_v17, %v872_v42  ;;  %v2235_v26 = vpack.c.bf16 %v882_v20, %v874_v18 }
 0x196   : > { %v2109_v27 = vpack.c.bf16 %v897_v22, %v889_v21 }
 0x197   : > { %2088 = vmatpush1.bf16.msra.mxu0 %v2087_v28  ;;  %v888_v28 = vld [vmem:[%s2776_s16 + $0xfa0] sm:$0xff] }
 0x198   : > { %2216 = vmatpush1.bf16.msra.mxu1 %v2215_v29  ;;  %2090 = vmatprep.subr.bf16.mxu0 %v2089_v30  ;;  %v896_v29 = vld [vmem:[%s2776_s16 + $0xfe0] sm:$0xff]  ;;  %v2237_v30 = vpack.c.bf16 %v899_v24, %v891_v23  ;;  %v1554_v24 = vld [vmem:[#allocation11] sm:$0xff] (!%p1722_p12) }
 0x199   : > { %2218 = vmatprep.subr.bf16.mxu1 %v2217_v35  ;;  %v2111_v33 = vpack.c.bf16 %v896_v29, %v888_v28  ;;  %v2239_v35 = vpack.c.bf16 %v898_v32, %v890_v31 }
 0x19b   : > { %2092 = vmatpush1.bf16.msra.mxu0 %v2091_v43 }
 0x19c   : > { %2220 = vmatpush1.bf16.msra.mxu1 %v2219_v44  ;;  %2094 = vmatprep.subr.bf16.mxu0 %v2093_v45 }
 0x19d   : > { %2222 = vmatprep.subr.bf16.mxu1 %v2221_v49 }
 0x19f   : > { %2096 = vmatpush1.bf16.msra.mxu0 %v2095_v55 }
 0x1a0   : > { %2224 = vmatpush1.bf16.msra.mxu1 %v2223_v56  ;;  %2098 = vmatprep.subr.bf16.mxu0 %v2097_v57 }
 0x1a1   : > { %2226 = vmatprep.subr.bf16.mxu1 %v2225_v61  ;;  %v1498_v61 = vlaneseq (!%p1722_p12) }
 0x1a3   : > { %2100 = vmatpush1.bf16.msra.mxu0 %v2099_v3  ;;  %v1499_v62 = vshrl.u32 (!%p1722_p12), %v1498_v61, 7 }
 0x1a4   : > { %2228 = vmatpush1.bf16.msra.mxu1 %v2227_v4  ;;  %2102 = vmatprep.subr.bf16.mxu0 %v2101_v5 }
 0x1a5   : > { %2230 = vmatprep.subr.bf16.mxu1 %v2229_v9  ;;  %v1500_v1 = vsub.s32 (!%p1722_p12), 0, %v1499_v62  ;;  %v1504_v2 = vsub.s32 (!%p1722_p12), 1, %v1499_v62  ;;  %v1508_v3 = vsub.s32 (!%p1722_p12), 2, %v1499_v62  ;;  %v1512_v4 = vsub.s32 (!%p1722_p12), 3, %v1499_v62 }
 0x1a6   : > { %v1516_v8 = vsub.s32 (!%p1722_p12), 4, %v1499_v62  ;;  %v1520_v9 = vsub.s32 (!%p1722_p12), 5, %v1499_v62  ;;  %v1524_v10 = vsub.s32 (!%p1722_p12), 6, %v1499_v62  ;;  %v1528_v42 = vsub.s32 (!%p1722_p12), 7, %v1499_v62 }
 0x1a7   : > { %2104 = vmatpush1.bf16.msra.mxu0 %v2103_v14  ;;  %v1501_v11 = vrot.slane (!%p1722_p12), %v1496_v63, %v1500_v1  ;;  %v1505_v12 = vrot.slane (!%p1722_p12), %v1496_v63, %v1504_v2  ;;  %v1509_v13 = vrot.slane (!%p1722_p12), %v1496_v63, %v1508_v3  ;;  %v1513_v14 = vrot.slane (!%p1722_p12), %v1496_v63, %v1512_v4 }
 0x1a8   : > { %2232 = vmatpush1.bf16.msra.mxu1 %v2231_v15  ;;  %2106 = vmatprep.subr.bf16.mxu0 %v2105_v16  ;;  %v1517_v15 = vrot.slane (!%p1722_p12), %v1496_v63, %v1516_v8  ;;  %v1521_v16 = vrot.slane (!%p1722_p12), %v1496_v63, %v1520_v9  ;;  %v1525_v22 = vrot.slane (!%p1722_p12), %v1496_v63, %v1524_v10 }
 0x1a9   : > { %2234 = vmatprep.subr.bf16.mxu1 %v2233_v19  ;;  %v1529_v29 = vrot.slane (!%p1722_p12), %v1496_v63, %v1528_v42 }
 0x1ab   : > { %2108 = vmatpush1.bf16.msra.mxu0 %v2107_v25 }
 0x1ac   : > { %2236 = vmatpush1.bf16.msra.mxu1 %v2235_v26  ;;  %2110 = vmatprep.subr.bf16.mxu0 %v2109_v27 }
 0x1ad   : > { %2238 = vmatprep.subr.bf16.mxu1 %v2237_v30 }
 0x1af   : > { %2112 = vmatpush1.bf16.msra.mxu0 %v2111_v33  ;;  %v1559_v33 = vrot.slane (!%p1722_p12), %v1554_v24, %v1500_v1 }
 0x1b0   : > { %2240 = vmatpush1.bf16.msra.mxu1 %v2239_v35  ;;  %v1563_v35 = vrot.slane (!%p1722_p12), %v1554_v24, %v1504_v2 }
 0x1b2   : > { %1320 = vmatmul.mubr.f32.vlgmr.msra.gmra.mrb[2].mxu0 %v3077_v40 }
 0x1b3   : > { %1462 = vmatmul.mubr.f32.vlgmr.msra.gmra.mrb[2].mxu1 %v3077_v40 }
 0x205   : > { %v1037_v39 = vpop.f32.mrb[0].mxu0 }
 0x206   : > { %v1468_v43 = vadd.f32 %v1037_v39, %v373_v36  ;;  %v1179_v44 = vpop.f32.mrb[0].mxu1  ;;  %v1039_v45 = vpop.f32.mrb[1].mxu0  ;;  %v1567_v36 = vrot.slane (!%p1722_p12), %v1554_v24, %v1508_v3 }
 0x207   : > { %v1470_v46 = vadd.f32 %v1179_v44, %v375_v37  ;;  %v1469_v47 = vadd.f32 %v1039_v45, %v374_v38  ;;  %v1181_v48 = vpop.f32.mrb[1].mxu1  ;;  %v1571_v37 = vrot.slane (!%p1722_p12), %v1554_v24, %v1512_v4 }
 0x208   : > { %1476 = vst [vmem:[#allocation3] sm:$0xff] %v1468_v43  ;;  %v1471_v49 = vadd.f32 %v1181_v48, %v376_v41  ;;  %v1575_v41 = vrot.slane (!%p1722_p12), %v1554_v24, %v1516_v8  ;;  %v1579_v48 = vrot.slane (!%p1722_p12), %v1554_v24, %v1520_v9 }
 0x209   : > { %1478 = vst [vmem:[#allocation3 + $0x10] sm:$0xff] %v1470_v46  ;;  %1477 = vst [vmem:[#allocation3 + $0x8] sm:$0xff] %v1469_v47 }
 0x20a   : > { %1479 = vst [vmem:[#allocation3 + $0x18] sm:$0xff] %v1471_v49 }
 0x20f   : > { %v1488_v0 = vld [vmem:[#allocation3] sm:$0xff] (!%p1722_p12) }
 0x210   : > { %v1489_v5 = vld [vmem:[#allocation3 + $0x8] sm:$0xff] (!%p1722_p12)  ;;  %v1490_v6 = vld [vmem:[#allocation3 + $0x10] sm:$0xff] (!%p1722_p12)  ;;  %v1538_v18 = vadd.f32 (!%p1722_p12), %v1501_v11, %v1488_v0  ;;  %v1723_v0 = vld [vmem:[#allocation4] ss:$0 sm:$0xff] (!%p1722_p12) }
 0x211   : > { %v1491_v7 = vld [vmem:[#allocation3 + $0x18] sm:$0xff] (!%p1722_p12)  ;;  %v1539_v19 = vadd.f32 (!%p1722_p12), %v1505_v12, %v1489_v5  ;;  %v1540_v20 = vadd.f32 (!%p1722_p12), %v1509_v13, %v1490_v6 }
 0x212   : > { %v1541_v21 = vadd.f32 (!%p1722_p12), %v1513_v14, %v1491_v7  ;;  %v1546_v26 = vmax.f32 (!%p1722_p12), %v1538_v18, 0.0 }
 0x213   : > { %v1547_v27 = vmax.f32 (!%p1722_p12), %v1539_v19, 0.0  ;;  %v1548_v28 = vmax.f32 (!%p1722_p12), %v1540_v20, 0.0 }
 0x214   : > { %v1549_v31 = vmax.f32 (!%p1722_p12), %v1541_v21, 0.0  ;;  %v1596_v43 = vmul.f32 (!%p1722_p12), %v1559_v33, %v1546_v26 }
 0x215   : > { %v1597_v44 = vmul.f32 (!%p1722_p12), %v1563_v35, %v1547_v27  ;;  %v1598_v45 = vmul.f32 (!%p1722_p12), %v1567_v36, %v1548_v28 }
 0x216   : > { %v1599_v49 = vmul.f32 (!%p1722_p12), %v1571_v37, %v1549_v31 }
 0x284   : > { %1487 = sbr.rel (%p1722_p12) target bundleno = 815 (0x32f), region = 72 }
 0x285   : > { %v1321_v40 = vpop.f32.mrb[2].mxu0 }
 0x286   : > { %v1472_v54 = vadd.f32 %v1321_v40, %v377_v50  ;;  %v1463_v55 = vpop.f32.mrb[2].mxu1  ;;  %v1323_v56 = vpop.f32.mrb[3].mxu0  ;;  %v1604_v50 = vadd.f32 (!%p1722_p12), %v1597_v44, %v1596_v43 }
 0x287   : > { %v1474_v57 = vadd.f32 %v1463_v55, %v379_v51  ;;  %v1473_v58 = vadd.f32 %v1323_v56, %v378_v52  ;;  %v1465_v59 = vpop.f32.mrb[3].mxu1  ;;  %v1583_v52 = vrot.slane (!%p1722_p12), %v1554_v24, %v1524_v10  ;;  %v1587_v55 = vrot.slane (!%p1722_p12), %v1554_v24, %v1528_v42 }
 0x288   : > { %1480 = vst [vmem:[#allocation3 + $0x20] sm:$0xff] %v1472_v54  ;;  %v1475_v60 = vadd.f32 %v1465_v59, %v380_v53  ;;  %v1605_v53 = vadd.f32 (!%p1722_p12), %v1604_v50, %v1598_v45 }
 0x289   : > { %1482 = vst [vmem:[#allocation3 + $0x30] sm:$0xff] %v1474_v57  ;;  %1481 = vst [vmem:[#allocation3 + $0x28] sm:$0xff] %v1473_v58 }
 0x28a   : > { %1483 = vst [vmem:[#allocation3 + $0x38] sm:$0xff] %v1475_v60  ;;  %v1606_v57 = vadd.f32 (!%p1722_p12), %v1605_v53, %v1599_v49 }
 0x28f   : > { %v1492_v34 = vld [vmem:[#allocation3 + $0x20] sm:$0xff] }
 0x290   : > { %v1493_v17 = vld [vmem:[#allocation3 + $0x28] sm:$0xff]  ;;  %v1542_v23 = vadd.f32 %v1517_v15, %v1492_v34  ;;  %v1494_v25 = vld [vmem:[#allocation3 + $0x30] sm:$0xff] }
 0x291   : > { %v1543_v30 = vadd.f32 %v1521_v16, %v1493_v17  ;;  %v1495_v32 = vld [vmem:[#allocation3 + $0x38] sm:$0xff]  ;;  %v1544_v38 = vadd.f32 %v1525_v22, %v1494_v25 }
 0x292   : > { %v1550_v39 = vmax.f32 %v1542_v23, 0.0  ;;  %v1545_v46 = vadd.f32 %v1529_v29, %v1495_v32 }
 0x293   : > { %v1551_v47 = vmax.f32 %v1543_v30, 0.0  ;;  %v1552_v51 = vmax.f32 %v1544_v38, 0.0 }
 0x294   : > { %v1600_v40 = vmul.f32 %v1575_v41, %v1550_v39  ;;  %v1553_v54 = vmax.f32 %v1545_v46, 0.0 }
 0x295   : > { %v1601_v56 = vmul.f32 %v1579_v48, %v1551_v47  ;;  %v1602_v58 = vmul.f32 %v1583_v52, %v1552_v51 }
 0x296   : > { %v1607_v59 = vadd.f32 %v1606_v57, %v1600_v40  ;;  %v1603_v60 = vmul.f32 %v1587_v55, %v1553_v54 }
 0x298   : > { %v1608_v61 = vadd.f32 %v1607_v59, %v1601_v56 }
 0x29a   : > { %v1609_v62 = vadd.f32 %v1608_v61, %v1602_v58 }
 0x29c   : > { %v1610_v63 = vadd.f32 %v1609_v62, %v1603_v60 }
 0x29e   : > { %1611 = vadd.xlane.f32.xlu0 %v1610_v63 }
 0x32b   : > { %v1612_v1 = vpop.xlane.xlu0 %1611 }
 0x32c   : > { %v1620_v2 = vadd.f32 %v1723_v0, %v1612_v1 }
 0x32e   : > { %1622 = vst.msk [vmem:[%s3355_s6] sm:$0xff] %vm1621_vm1, %v1620_v2 }
 0x32f PF: > { %p18_p0 = scmp.ge.s32.totalorder %s2710_s17, 6   ;;  %s3375_s23 = smov %s2517_s24 }
 0x330   : > { %s3376_s24 = smov %s2521_s25  ;;  %s3377_s25 = smov %s2721_s8 }
 0x331   : > { %s3378_s26 = smov %s2710_s17  ;;  %20 = sbr.rel (!%p18_p0) target bundleno = 7 (0x7), region = 107 }
 0x338   :  { %1634 = vsyncpa [#allocation6], 1 }
 0x339   :  { %1636 = vsyncpa [#allocation6 + $0x1], 1 }
 0x33a   :  { %1637 = vsyncpa [#allocation8], 1 }
 0x33b   :  { %1638 = vsyncpa [#allocation12], 1 }

</bundles_post_ra>
